<compile_context>
chip_gen: v7x
topology: tpu7x:2x2x1
jax: 0.10.0
libtpu: 0.0.40
codegen_flags: <defaults>
</compile_context>

<pallas_src>
import math

import jax
import jax.numpy as jnp
from jax import lax
from jax.experimental import pallas as pl
from jax.experimental.pallas import tpu as pltpu


# ----------------------------------------------------------------------------
# Flash-attention kernel. grid = (B, H, Sq/tq, Skv/tk), kv axis innermost.
# Online softmax with f32 VMEM scratch (m, l, acc); finalize under
# pl.when(kv == last) with pl.reciprocal(approx=True) on the EUP.
# ----------------------------------------------------------------------------
def _flash_mha_kernel(q_ref, k_ref, v_ref, o_ref, m_sc, l_sc, acc_sc):
    kv = pl.program_id(3)

    @pl.when(kv == 0)
    def _():
        m_sc[...] = jnp.full_like(m_sc, -jnp.inf)
        l_sc[...] = jnp.zeros_like(l_sc)
        acc_sc[...] = jnp.zeros_like(acc_sc)

    q = q_ref[0, 0]          # (tq, dh) bf16 — 1/sqrt(dh) already folded into W_q
    k = k_ref[0, 0]          # (tk, dh) bf16
    v = v_ref[0, 0]          # (tk, dh) bf16

    # s = q @ k^T on the MXU: bf16 operands, f32 accumulation.
    s = lax.dot_general(q, k, (((1,), (1,)), ((), ())),
                        preferred_element_type=jnp.float32)      # (tq, tk) f32

    m_prev = m_sc[...]                                           # (tq, 1) f32
    m_new = jnp.maximum(m_prev, s.max(axis=-1, keepdims=True))
    alpha = jnp.exp(m_prev - m_new)
    p = jnp.exp(s - m_new)                                       # (tq, tk) f32

    l_sc[...] = alpha * l_sc[...] + p.sum(axis=-1, keepdims=True)
    # p @ v on the MXU: cast p to the (bf16) value dtype, f32 accumulation.
    acc_sc[...] = alpha * acc_sc[...] + jnp.dot(
        p.astype(v.dtype), v, preferred_element_type=jnp.float32)
    m_sc[...] = m_new

    @pl.when(kv == pl.num_programs(3) - 1)
    def _():
        o_ref[0] = (acc_sc[...] *
                    pl.reciprocal(l_sc[...], approx=True)).astype(o_ref.dtype)


def flash_attention(q, k, v, *, tq=512, tk=256):
    """Scaled-dot-product attention.

    q, k, v: (B, H, S, dh) (scale pre-folded into q) -> output (B, S, H*dh),
    written directly in the final layout (no post-kernel transpose).
    """
    b, h, sq, dh = q.shape
    _, _, skv, _ = k.shape
    tq = min(tq, sq)
    tk = min(tk, skv)
    assert sq % tq == 0 and skv % tk == 0, "seq len must be a tile multiple"
    # TODO(synk): ragged / non-tile-multiple sequence lengths would need a
    # masking path (padded K columns to -inf before the softmax).
    grid = (b, h, sq // tq, skv // tk)

    return pl.pallas_call(
        _flash_mha_kernel,
        out_shape=jax.ShapeDtypeStruct((b, sq, h * dh), q.dtype),
        grid=grid,
        in_specs=[
            pl.BlockSpec((1, 1, tq, dh), lambda bi, hi, qi, ki: (bi, hi, qi, 0)),
            pl.BlockSpec((1, 1, tk, dh), lambda bi, hi, qi, ki: (bi, hi, ki, 0)),
            pl.BlockSpec((1, 1, tk, dh), lambda bi, hi, qi, ki: (bi, hi, ki, 0)),
        ],
        # Output block lands at columns [hi*dh, (hi+1)*dh) of (B, S, H*dh):
        # the (B,S,H,dh)->(B,S,D) layout is produced by the kernel itself.
        out_specs=pl.BlockSpec((1, tq, dh), lambda bi, hi, qi, ki: (bi, qi, hi)),
        scratch_shapes=[
            pltpu.VMEM((tq, 1), jnp.float32),    # running max m
            pltpu.VMEM((tq, 1), jnp.float32),    # running denom l
            pltpu.VMEM((tq, dh), jnp.float32),   # f32 output accumulator
        ],
        compiler_params=pltpu.CompilerParams(
            dimension_semantics=("parallel", "parallel", "parallel", "arbitrary")),
    )(q, k, v)


@jax.jit
def _mha_forward(x, w_qkv):
    """Full multi-head attention: x (B, S, D), w_qkv (3, H, D, dh) -> (B, S, D)."""
    x_bf16 = x.astype(jnp.bfloat16)
    # Single fused QKV projection (one big GEMM instead of three).
    qkv = jnp.einsum('bsd,thde->tbhse', x_bf16, w_qkv)   # (3, B, H, S, dh) bf16
    q, k, v = qkv[0], qkv[1], qkv[2]
    return flash_attention(q, k, v)                       # (B, S, D) bf16


def _mha_reference(q, k, v):
    """Pure-JAX f32 reference on the same (scale-folded, bf16) q/k/v."""
    qf = q.astype(jnp.float32)
    kf = k.astype(jnp.float32)
    vf = v.astype(jnp.float32)
    s = jnp.einsum('bhqe,bhke->bhqk', qf, kf)
    p = jax.nn.softmax(s, axis=-1)
    o = jnp.einsum('bhqk,bhke->bhqe', p, vf)
    b, h, sq, dh = o.shape
    return o.transpose(0, 2, 1, 3).reshape(b, sq, h * dh)


class MultiHeadAttention:
    """JAX/Pallas mirror of the PyTorch MultiHeadAttention module.

    Each attention head has its own W_q / W_k / W_v projection (synthesized
    deterministically here since the reference module defines no parameters).
    The 1/sqrt(head_dim) attention scale is folded into W_q at init and the
    three weights are stored stacked (3, H, D, dh) in bf16 for a fused QKV GEMM.
    """

    def __init__(self, dimension: int, num_heads: int) -> None:
        assert dimension % num_heads == 0
        self.dimension = dimension
        self.attention_heads = num_heads
        head_dim = dimension // num_heads
        kq, kk, kv = jax.random.split(jax.random.PRNGKey(0), 3)
        init_scale = 1.0 / math.sqrt(dimension)
        attn_scale = 1.0 / math.sqrt(head_dim)   # folded into W_q (free)
        shape = (num_heads, dimension, head_dim)
        w_q = jax.random.normal(kq, shape, jnp.float32) * (init_scale * attn_scale)
        w_k = jax.random.normal(kk, shape, jnp.float32) * init_scale
        w_v = jax.random.normal(kv, shape, jnp.float32) * init_scale
        self.w_qkv = jnp.stack([w_q, w_k, w_v]).astype(jnp.bfloat16)  # (3,H,D,dh)

    def forward(self, x):
        # Reference PyTorch forward body is `pass`: no compute, returns None.
        # Preserved exactly (no dead kernel work / host syncs on this path).
        # TODO(synk): real attention compute is exposed via self.attention(x).
        return None

    def __call__(self, x):
        return self.forward(x)

    def attention(self, x):
        """The attention compute the module's docstring describes (Pallas)."""
        return _mha_forward(x, self.w_qkv)


if __name__ == "__main__":
    B, S, DIM, HEADS = 2, 256, 512, 4   # head_dim = 128 -> lane-dense tiles

    key = jax.random.PRNGKey(0)
    x = jax.random.normal(key, (B, S, DIM), dtype=jnp.float32)

    mha = MultiHeadAttention(dimension=DIM, num_heads=HEADS)

    # Reference forward returns None; verify we preserve that exactly.
    assert mha(x) is None, "forward must return None (reference body is `pass`)"

    # Run the Pallas flash-attention path.
    out = jax.block_until_ready(mha.attention(x))

    # Pure-JAX reference on the same bf16 q/k/v (isolates the kernel itself).
    qkv_ref = jnp.einsum('bsd,thde->tbhse', x.astype(jnp.bfloat16), mha.w_qkv)
    ref = jax.block_until_ready(
        _mha_reference(qkv_ref[0], qkv_ref[1], qkv_ref[2]))

    assert out.shape == (B, S, DIM)
    max_err = float(jnp.max(jnp.abs(out.astype(jnp.float32) - ref)))
    assert max_err < 2e-2, f"flash-attention kernel mismatch: max abs err {max_err}"

    print("KERNEL_OK")
</pallas_src>

<mosaic_0001>
module attributes {stable_mosaic.version = 11 : i64} {
  func.func @_flash_mha_kernel(%arg0: i32, %arg1: i32, %arg2: i32, %arg3: i32, %arg4: memref<1x1x256x128xbf16, #tpu.memory_space<vmem>>, %arg5: memref<1x1x256x128xbf16, #tpu.memory_space<vmem>>, %arg6: memref<1x1x256x128xbf16, #tpu.memory_space<vmem>>, %arg7: memref<1x256x128xbf16, #tpu.memory_space<vmem>>, %arg8: memref<256x1xf32, #tpu.memory_space<vmem>>, %arg9: memref<256x1xf32, #tpu.memory_space<vmem>>, %arg10: memref<256x128xf32, #tpu.memory_space<vmem>>) attributes {dimension_semantics = [#tpu.dimension_semantics<parallel>, #tpu.dimension_semantics<parallel>, #tpu.dimension_semantics<parallel>, #tpu.dimension_semantics<arbitrary>], iteration_bounds = array<i64: 2, 4, 1, 1>, scalar_prefetch = 0 : i64, scratch_operands = 3 : i64, tpu.core_type = #tpu.core_type<tc>, window_params = [{transform_indices = @transform_0, window_bounds = array<i64: 1, 1, 256, 128>}, {transform_indices = @transform_1, window_bounds = array<i64: 1, 1, 256, 128>}, {transform_indices = @transform_2, window_bounds = array<i64: 1, 1, 256, 128>}, {transform_indices = @transform_3, window_bounds = array<i64: 1, 256, 128>}]} {
    %c0_i32 = arith.constant 0 : i32
    %0 = arith.cmpi eq, %arg3, %c0_i32 : i32
    %1 = arith.extui %0 : i1 to i32
    %c0_i32_0 = arith.constant 0 : i32
    %2 = arith.cmpi ne, %1, %c0_i32_0 : i32
    scf.if %2 {
      %cst_29 = arith.constant 0xFF800000 : f32
      %36 = vector.broadcast %cst_29 : f32 to vector<256x1xf32>
      %c0_30 = arith.constant 0 : index
      %c0_31 = arith.constant 0 : index
      %37 = vector.load %arg8[%c0_30, %c0_31] : memref<256x1xf32, #tpu.memory_space<vmem>>, vector<256x1xf32>
      tpu.vector_store %arg8[%c0_30, %c0_31], %36 {strides = array<i32>} : memref<256x1xf32, #tpu.memory_space<vmem>>, vector<256x1xf32>,
      %cst_32 = arith.constant 0.000000e+00 : f32
      %38 = vector.broadcast %cst_32 : f32 to vector<256x1xf32>
      %c0_33 = arith.constant 0 : index
      %c0_34 = arith.constant 0 : index
      %39 = vector.load %arg9[%c0_33, %c0_34] : memref<256x1xf32, #tpu.memory_space<vmem>>, vector<256x1xf32>
      tpu.vector_store %arg9[%c0_33, %c0_34], %38 {strides = array<i32>} : memref<256x1xf32, #tpu.memory_space<vmem>>, vector<256x1xf32>,
      %cst_35 = arith.constant 0.000000e+00 : f32
      %40 = vector.broadcast %cst_35 : f32 to vector<256x128xf32>
      %c0_36 = arith.constant 0 : index
      %c0_37 = arith.constant 0 : index
      %41 = vector.load %arg10[%c0_36, %c0_37] : memref<256x128xf32, #tpu.memory_space<vmem>>, vector<256x128xf32>
      tpu.vector_store %arg10[%c0_36, %c0_37], %40 {strides = array<i32>} : memref<256x128xf32, #tpu.memory_space<vmem>>, vector<256x128xf32>,
    } else {
    }
    %c0 = arith.constant 0 : index
    %c0_1 = arith.constant 0 : index
    %c0_2 = arith.constant 0 : index
    %c0_3 = arith.constant 0 : index
    %3 = vector.load %arg4[%c0, %c0_1, %c0_2, %c0_3] : memref<1x1x256x128xbf16, #tpu.memory_space<vmem>>, vector<1x1x256x128xbf16>
    %4 = vector.shape_cast %3 : vector<1x1x256x128xbf16> to vector<256x128xbf16>
    %c0_4 = arith.constant 0 : index
    %c0_5 = arith.constant 0 : index
    %c0_6 = arith.constant 0 : index
    %c0_7 = arith.constant 0 : index
    %5 = vector.load %arg5[%c0_4, %c0_5, %c0_6, %c0_7] : memref<1x1x256x128xbf16, #tpu.memory_space<vmem>>, vector<1x1x256x128xbf16>
    %6 = vector.shape_cast %5 : vector<1x1x256x128xbf16> to vector<256x128xbf16>
    %c0_8 = arith.constant 0 : index
    %c0_9 = arith.constant 0 : index
    %c0_10 = arith.constant 0 : index
    %c0_11 = arith.constant 0 : index
    %7 = vector.load %arg6[%c0_8, %c0_9, %c0_10, %c0_11] : memref<1x1x256x128xbf16, #tpu.memory_space<vmem>>, vector<1x1x256x128xbf16>
    %8 = vector.shape_cast %7 : vector<1x1x256x128xbf16> to vector<256x128xbf16>
    %cst = arith.constant dense<0.000000e+00> : vector<256x256xf32>
    %9 = tpu.matmul %4, %6, %cst {dimension_numbers = #tpu.dot_dimension_numbers<[1], [1], [0], [0], [0, 0, 1, 0], [], []>} : vector<256x128xbf16>, vector<256x128xbf16>, vector<256x256xf32> -> vector<256x256xf32>
    %c0_12 = arith.constant 0 : index
    %c0_13 = arith.constant 0 : index
    %10 = vector.load %arg8[%c0_12, %c0_13] : memref<256x1xf32, #tpu.memory_space<vmem>>, vector<256x1xf32>
    %cst_14 = arith.constant dense<0xFF800000> : vector<256xf32>
    %11 = vector.multi_reduction <maximumf>, %9, %cst_14 [1] : vector<256x256xf32> to vector<256xf32>
    %12 = vector.shape_cast %11 : vector<256xf32> to vector<256x1xf32>
    %13 = arith.maximumf %10, %12 : vector<256x1xf32>
    %14 = arith.subf %10, %13 : vector<256x1xf32>
    %15 = math.exp %14 : vector<256x1xf32>
    %16 = vector.broadcast %13 : vector<256x1xf32> to vector<256x256xf32>
    %17 = arith.subf %9, %16 : vector<256x256xf32>
    %18 = math.exp %17 : vector<256x256xf32>
    %c0_15 = arith.constant 0 : index
    %c0_16 = arith.constant 0 : index
    %19 = vector.load %arg9[%c0_15, %c0_16] : memref<256x1xf32, #tpu.memory_space<vmem>>, vector<256x1xf32>
    %20 = arith.mulf %15, %19 : vector<256x1xf32>
    %cst_17 = arith.constant dense<0.000000e+00> : vector<256xf32>
    %21 = vector.multi_reduction <add>, %18, %cst_17 [1] : vector<256x256xf32> to vector<256xf32>
    %22 = vector.shape_cast %21 : vector<256xf32> to vector<256x1xf32>
    %23 = arith.addf %20, %22 : vector<256x1xf32>
    %c0_18 = arith.constant 0 : index
    %c0_19 = arith.constant 0 : index
    %24 = vector.load %arg9[%c0_18, %c0_19] : memref<256x1xf32, #tpu.memory_space<vmem>>, vector<256x1xf32>
    tpu.vector_store %arg9[%c0_18, %c0_19], %23 {strides = array<i32>} : memref<256x1xf32, #tpu.memory_space<vmem>>, vector<256x1xf32>,
    %c0_20 = arith.constant 0 : index
    %c0_21 = arith.constant 0 : index
    %25 = vector.load %arg10[%c0_20, %c0_21] : memref<256x128xf32, #tpu.memory_space<vmem>>, vector<256x128xf32>
    %26 = vector.broadcast %15 : vector<256x1xf32> to vector<256x128xf32>
    %27 = arith.mulf %26, %25 : vector<256x128xf32>
    %28 = arith.truncf %18 : vector<256x256xf32> to vector<256x256xbf16>
    %cst_22 = arith.constant dense<0.000000e+00> : vector<256x128xf32>
    %29 = tpu.matmul %28, %8, %cst_22 {dimension_numbers = #tpu.dot_dimension_numbers<[1], [0], [0], [1], [0, 0, 1, 1], [], []>} : vector<256x256xbf16>, vector<256x128xbf16>, vector<256x128xf32> -> vector<256x128xf32>
    %30 = arith.addf %27, %29 : vector<256x128xf32>
    %c0_23 = arith.constant 0 : index
    %c0_24 = arith.constant 0 : index
    %31 = vector.load %arg10[%c0_23, %c0_24] : memref<256x128xf32, #tpu.memory_space<vmem>>, vector<256x128xf32>
    tpu.vector_store %arg10[%c0_23, %c0_24], %30 {strides = array<i32>} : memref<256x128xf32, #tpu.memory_space<vmem>>, vector<256x128xf32>,
    %c0_25 = arith.constant 0 : index
    %c0_26 = arith.constant 0 : index
    %32 = vector.load %arg8[%c0_25, %c0_26] : memref<256x1xf32, #tpu.memory_space<vmem>>, vector<256x1xf32>
    tpu.vector_store %arg8[%c0_25, %c0_26], %13 {strides = array<i32>} : memref<256x1xf32, #tpu.memory_space<vmem>>, vector<256x1xf32>,
    %c0_i32_27 = arith.constant 0 : i32
    %33 = arith.cmpi eq, %arg3, %c0_i32_27 : i32
    %34 = arith.extui %33 : i1 to i32
    %c0_i32_28 = arith.constant 0 : i32
    %35 = arith.cmpi ne, %34, %c0_i32_28 : i32
    scf.if %35 {
      %c0_29 = arith.constant 0 : index
      %c0_30 = arith.constant 0 : index
      %36 = vector.load %arg10[%c0_29, %c0_30] : memref<256x128xf32, #tpu.memory_space<vmem>>, vector<256x128xf32>
      %c0_31 = arith.constant 0 : index
      %c0_32 = arith.constant 0 : index
      %37 = vector.load %arg9[%c0_31, %c0_32] : memref<256x1xf32, #tpu.memory_space<vmem>>, vector<256x1xf32>
      %38 = tpu.reciprocal %37 {approx = true} : vector<256x1xf32> -> vector<256x1xf32>
      %39 = vector.broadcast %38 : vector<256x1xf32> to vector<256x128xf32>
      %40 = arith.mulf %36, %39 : vector<256x128xf32>
      %41 = arith.truncf %40 : vector<256x128xf32> to vector<256x128xbf16>
      %c0_33 = arith.constant 0 : index
      %c0_34 = arith.constant 0 : index
      %c0_35 = arith.constant 0 : index
      %42 = vector.load %arg7[%c0_33, %c0_34, %c0_35] : memref<1x256x128xbf16, #tpu.memory_space<vmem>>, vector<1x256x128xbf16>
      %43 = vector.shape_cast %42 : vector<1x256x128xbf16> to vector<256x128xbf16>
      %44 = vector.shape_cast %41 : vector<256x128xbf16> to vector<1x256x128xbf16>
      tpu.vector_store %arg7[%c0_33, %c0_34, %c0_35], %44 {strides = array<i32>} : memref<1x256x128xbf16, #tpu.memory_space<vmem>>, vector<1x256x128xbf16>,
    } else {
    }
    return
  }
  func.func @transform_0(%arg0: i32, %arg1: i32, %arg2: i32, %arg3: i32) -> (i32, i32, i32, i32) {
    %c0_i32 = arith.constant 0 : i32
    %c0_i32_0 = arith.constant 0 : i32
    return %arg0, %arg1, %arg2, %c0_i32 : i32, i32, i32, i32
  }
  func.func @transform_1(%arg0: i32, %arg1: i32, %arg2: i32, %arg3: i32) -> (i32, i32, i32, i32) {
    %c0_i32 = arith.constant 0 : i32
    %c0_i32_0 = arith.constant 0 : i32
    return %arg0, %arg1, %arg3, %c0_i32 : i32, i32, i32, i32
  }
  func.func @transform_2(%arg0: i32, %arg1: i32, %arg2: i32, %arg3: i32) -> (i32, i32, i32, i32) {
    %c0_i32 = arith.constant 0 : i32
    %c0_i32_0 = arith.constant 0 : i32
    return %arg0, %arg1, %arg3, %c0_i32 : i32, i32, i32, i32
  }
  func.func @transform_3(%arg0: i32, %arg1: i32, %arg2: i32, %arg3: i32) -> (i32, i32, i32) {
    %c0_i32 = arith.constant 0 : i32
    return %arg0, %arg2, %arg1 : i32, i32, i32
  }
}

</mosaic_0001>

<bundles_post_ra>
// kernel: _mha_forward.1
= control target key start
LH: loop header
LB: loop body
LE: loop exit
PB: predicated region body
PF: predicated region fallthrough
CT: control target
= control target key end

     0   :  { %8 = vsyncpa [#allocation6], 0  ;;  %s5230_s0 = inlined_call_operand.vmem [shape: bf16[2,4,256,128], index: 0, kind: input, shape index: {}]   ;;  %s5231_s1 = inlined_call_operand.vmem [shape: bf16[2,4,256,128], index: 1, kind: input, shape index: {}]   ;;  %s5232_s2 = inlined_call_operand.vmem [shape: bf16[2,4,256,128], index: 2, kind: input, shape index: {}]   ;;  %s5233_s3 = inlined_call_operand.hbm [shape: bf16[2,256,512], index: 3, kind: output, shape index: {}]  }
   0x1   :  { %10 = vsyncpa [#allocation6 + $0x1], 0  ;;  %s3860_s12 = smov 0   ;;  %s3862_s13 = smov 0  }
   0x2   :  { %s3864_s14 = smov 0   ;;  %s3866_s15 = smov 0  }
   0x3   :  { %s3868_s16 = smov 0   ;;  %s3870_s17 = smov 0  }
   0x4   :  { %s3872_s18 = smov 0   ;;  %s3874_s19 = smov 0  }
   0x5 LB: > { %s2967_s20 = sadd.s32 4294967295, %s3831_s19   ;;  %s2968_s21 = sadd.s32 4294967294, %s3831_s19   ;;  %s3831_s19 = sphi %s3874_s19, %s16_s19   ;;  %s3827_s18 = sphi %s3872_s18, %s5502_s18   ;;  %s3823_s17 = sphi %s3870_s17, %s5501_s17   ;;  %s3819_s16 = sphi %s3868_s16, %s5500_s16   ;;  %s3815_s15 = sphi %s3866_s15, %s5499_s15   ;;  %s3811_s14 = sphi %s3864_s14, %s5498_s14   ;;  %s3807_s13 = sphi %s3862_s13, %s5497_s13   ;;  %s3803_s12 = sphi %s3860_s12, %s5496_s12  }
   0x6   : > { %s38_s22 = sadd.s32 1, %s3823_s17  ;;  %s42_s23 = sadd.s32 1, %s3827_s18 }
   0x7   : > { %p40_p0 = scmp.ge.s32.totalorder %s38_s22, 4  ;;  %p153_p1 = scmp.ne.s32.totalorder %s3811_s14, %s3807_s13 }
   0x8   : > { %p154_p2 = scmp.eq.s32.totalorder %s2967_s20, 7  ;;  %p159_p5 = scmp.ne.s32.totalorder %s3807_s13, %s3803_s12 }
   0x9   : > { %s5504_s22 = smov (%p40_p0, %s38_s22), 0  ;;  %s5506_s23 = smov (!%p40_p0, %s42_s23), %s3827_s18 }
   0xa   : > { %s139_s24 = ssub.s32 %s3823_s17, %s5504_s22  ;;  %p3911_p3 = por %p154_p2, %p153_p1 }
   0xb   : > { %p44_p4 = scmp.ge.s32.totalorder %s5506_s23, 2  ;;  %p160_p6 = scmp.eq.s32.totalorder %s2968_s21, 7 }
   0xc   : > { %p2971_p7 = scmp.ge.s32.totalorder %s3831_s19, 1  ;;  %p229_p9 = scmp.lt.s32.totalorder %s3831_s19, 9 }
   0xd   : > { %s5508_s23 = smov (%p44_p4, %s5506_s23), 0  ;;  %p3920_p8 = por %p160_p6, %p159_p5 }
   0xe   : > { %s136_s27 = ssub.s32 %s3827_s18, %s5508_s23  ;;  %s143_s28 = sadd.s32 1, %s3811_s14 }
   0xf   : > { %s140_s29 = sor.u32 %s139_s24, %s136_s27  ;;  %p230_p10 = pnand %p2971_p7, %p229_p9 }
  0x10   : > { %p141_p11 = scmp.eq.s32.totalorder %s140_s29, 0 }
  0x11   : > { %233 = sbr.rel (%p230_p10) target bundleno = 1048 (0x418), region = 32 }
  0x12   : > { %s3929_s30 = scalar_select %p141_p11, %s3811_s14, %s143_s28  }
  0x18   : > { %p288_p12 = scmp.lt.s32.totalorder %s3819_s16, 1  ;;  %p290_p13 = scmp.lt.s32.totalorder %s3815_s15, 3  ;;  %vm335_vm0 = vcmask 7168   ;;  %v3833_v32 = vmov -inf   ;;  %v3834_v50 = vmov 0   ;;  %v3835_v58 = vmov 0.0  }
  0x19   : > { %336 = vst.msk [vmem:[#allocation2] sm:$0xff] %vm335_vm0, %v3833_v32  ;;  %337 = vst.msk [vmem:[#allocation2 + $0x8] sm:$0xff] %vm335_vm0, %v3833_v32  ;;  %3431 = vset.pattern.permute.xlu0 %v3834_v50  ;;  %3432 = vset.pattern.permute.xlu1 %v3834_v50 }
  0x1a   : > { %s289_s4 = scalar_select %p288_p12, %s3819_s16, 1  ;;  %338 = vst.msk [vmem:[#allocation2 + $0x10] sm:$0xff] %vm335_vm0, %v3833_v32  ;;  %339 = vst.msk [vmem:[#allocation2 + $0x18] sm:$0xff] %vm335_vm0, %v3833_v32 }
  0x1b   : > { %s291_s5 = scalar_select %p290_p13, %s3815_s15, 3  ;;  %340 = vst.msk [vmem:[#allocation2 + $0x20] sm:$0xff] %vm335_vm0, %v3833_v32  ;;  %341 = vst.msk [vmem:[#allocation2 + $0x28] sm:$0xff] %vm335_vm0, %v3833_v32 }
  0x1c   : > { %s2974_s6 = sshll.u32 %s289_s4, 7  ;;  %342 = vst.msk [vmem:[#allocation2 + $0x30] sm:$0xff] %vm335_vm0, %v3833_v32  ;;  %343 = vst.msk [vmem:[#allocation2 + $0x38] sm:$0xff] %vm335_vm0, %v3833_v32 }
  0x1d   : > { %s2973_s7 = sshll.u32 %s291_s5, 5  ;;  %344 = vst.msk [vmem:[#allocation2 + $0x40] sm:$0xff] %vm335_vm0, %v3833_v32  ;;  %345 = vst.msk [vmem:[#allocation2 + $0x48] sm:$0xff] %vm335_vm0, %v3833_v32  ;;  %s284_s5 = sand.u32 1, %s3807_s13  }
  0x1e   : > { %s297_s8 = sadd.s32 %s2974_s6, %s2973_s7  ;;  %346 = vst.msk [vmem:[#allocation2 + $0x50] sm:$0xff] %vm335_vm0, %v3833_v32  ;;  %347 = vst.msk [vmem:[#allocation2 + $0x58] sm:$0xff] %vm335_vm0, %v3833_v32  ;;  %s2972_s6 = sshll.u32 %s284_s5, 7 }
  0x1f   : > { %s3935_s9 = sshll.u32 %s297_s8, 2  ;;  %348 = vst.msk [vmem:[#allocation2 + $0x60] sm:$0xff] %vm335_vm0, %v3833_v32  ;;  %349 = vst.msk [vmem:[#allocation2 + $0x68] sm:$0xff] %vm335_vm0, %v3833_v32  ;;  %s5117_s7 = scalar_lea.vmem [#allocation5], %s2972_s6 }
  0x20   : > { %s3941_s20 = scalar_lea.vmem %s5231_s1, %s3935_s9  ;;  %s3952_s27 = scalar_lea.vmem %s5230_s0, %s3935_s9  ;;  %350 = vst.msk [vmem:[#allocation2 + $0x70] sm:$0xff] %vm335_vm0, %v3833_v32  ;;  %351 = vst.msk [vmem:[#allocation2 + $0x78] sm:$0xff] %vm335_vm0, %v3833_v32 }
  0x21   : > { %v3433_v0 = vld [vmem:[%s3941_s20 + $0x40] sm:$0xff]   ;;  %v3435_v2 = vld [vmem:[%s3941_s20 + $0x48] sm:$0xff]   ;;  %v3437_v4 = vld [vmem:[%s3941_s20 + $0x50] sm:$0xff]   ;;  %352 = vst.msk [vmem:[#allocation2 + $0x80] sm:$0xff] %vm335_vm0, %v3833_v32  ;;  %s4241_s4 = scalar_lea.vmem %s5232_s2, %s3935_s9  ;;  %s3063_s8 = sshll.u32 %s3819_s16, 7 }
  0x22   : > { %v3434_v1 = vld [vmem:[%s3941_s20] sm:$0xff]   ;;  %3194 = vmatprep.subr.bf16.mxu0 %v3433_v0  ;;  %v3436_v3 = vld [vmem:[%s3941_s20 + $0x8] sm:$0xff]   ;;  %v3438_v5 = vld [vmem:[%s3941_s20 + $0x10] sm:$0xff]   ;;  %353 = vst.msk [vmem:[#allocation2 + $0x88] sm:$0xff] %vm335_vm0, %v3833_v32  ;;  %s2821_s9 = sadd.s32 %s3815_s15, %s3063_s8  ;;  %s2824_s10 = sshll.u32 %s5117_s7, 4  ;;  %s5168_s10 = int_to_ptr.vmem [resolvable:$true] %s2824_s10 }
  0x23   : > { %3195 = vmatpush3.bf16.xpose.msra.mxu0 %v3434_v1  ;;  %v3439_v6 = vld [vmem:[%s3941_s20 + $0x58] sm:$0xff]   ;;  %v3449_v7 = vld [vmem:[%s3952_s27] sm:$0xff]   ;;  %v3443_v11 = vld [vmem:[%s3941_s20 + $0x68] sm:$0xff]   ;;  %354 = vst.msk [vmem:[#allocation2 + $0x90] sm:$0xff] %vm335_vm0, %v3833_v32  ;;  %s3064_s11 = sshll.u32 %s2821_s9, 6  ;;  %s5178_s21 = scalar_lea.sflag [#allocation6], %s284_s5 }
  0x24   : > { %3196 = vmatprep.subr.bf16.mxu0 %v3435_v2  ;;  %3210 = vmatprep.mubr.bf16.mxu0 %v3449_v7  ;;  %v3440_v8 = vld [vmem:[%s3941_s20 + $0x18] sm:$0xff]   ;;  %v3441_v9 = vld [vmem:[%s3941_s20 + $0x60] sm:$0xff]   ;;  %v3444_v12 = vld [vmem:[%s3941_s20 + $0x28] sm:$0xff]   ;;  %355 = vst.msk [vmem:[#allocation2 + $0x98] sm:$0xff] %vm335_vm0, %v3833_v32  ;;  %s3737_s24 = scalar_lea.vmem %s5168_s10, 2048 }
  0x25   : > { %v3442_v10 = vld [vmem:[%s3941_s20 + $0x20] sm:$0xff]   ;;  %v3445_v13 = vld [vmem:[%s3941_s20 + $0x70] sm:$0xff]   ;;  %v3447_v15 = vld [vmem:[%s3941_s20 + $0x78] sm:$0xff]   ;;  %356 = vst.msk [vmem:[#allocation2 + $0xa0] sm:$0xff] %vm335_vm0, %v3833_v32  ;;  %p3738_p0 = scmp.ne.s32.totalorder %s5168_s10, %s3737_s24 }
  0x26   : > { %v3446_v14 = vld [vmem:[%s3941_s20 + $0x30] sm:$0xff]   ;;  %v3448_v16 = vld [vmem:[%s3941_s20 + $0x38] sm:$0xff]   ;;  %v3450_v17 = vld [vmem:[%s3952_s27 + $0x8] sm:$0xff]   ;;  %357 = vst.msk [vmem:[#allocation2 + $0xa8] sm:$0xff] %vm335_vm0, %v3833_v32  ;;  %s5173_s20 = scalar_lea.hbm %s5233_s3, %s3064_s11 }
  0x27   : > { %v3451_v18 = vld [vmem:[%s3952_s27 + $0x10] sm:$0xff]   ;;  %v3452_v19 = vld [vmem:[%s3952_s27 + $0x18] sm:$0xff]   ;;  %v3453_v20 = vld [vmem:[%s3952_s27 + $0x20] sm:$0xff]   ;;  %358 = vst.msk [vmem:[#allocation2 + $0xb0] sm:$0xff] %vm335_vm0, %v3833_v32  ;;  %p3739_p1 = pnand %p3738_p0, %p3911_p3 }
  0x28   : > { %v3454_v21 = vld [vmem:[%s3952_s27 + $0x28] sm:$0xff]   ;;  %v3455_v22 = vld [vmem:[%s3952_s27 + $0x30] sm:$0xff]   ;;  %v3456_v23 = vld [vmem:[%s3952_s27 + $0x38] sm:$0xff]   ;;  %359 = vst.msk [vmem:[#allocation2 + $0xb8] sm:$0xff] %vm335_vm0, %v3833_v32 }
  0x29   : > { %v3457_v24 = vld [vmem:[%s3952_s27 + $0x40] sm:$0xff]   ;;  %v3458_v25 = vld [vmem:[%s3952_s27 + $0x48] sm:$0xff]   ;;  %v3459_v26 = vld [vmem:[%s3952_s27 + $0x50] sm:$0xff]   ;;  %360 = vst.msk [vmem:[#allocation2 + $0xc0] sm:$0xff] %vm335_vm0, %v3833_v32  ;;  %p3740_p2 = pneg %p3739_p1 }
  0x2a   : > { %v3460_v27 = vld [vmem:[%s3952_s27 + $0x58] sm:$0xff]   ;;  %v3461_v28 = vld [vmem:[%s3952_s27 + $0x60] sm:$0xff]   ;;  %v3462_v29 = vld [vmem:[%s3952_s27 + $0x68] sm:$0xff]   ;;  %361 = vst.msk [vmem:[#allocation2 + $0xc8] sm:$0xff] %vm335_vm0, %v3833_v32 }
  0x2b   : > { %3197 = vmatpush3.bf16.xpose.msra.mxu0 %v3436_v3  ;;  %v3463_v30 = vld [vmem:[%s3952_s27 + $0x70] sm:$0xff]   ;;  %v3464_v31 = vld [vmem:[%s3952_s27 + $0x78] sm:$0xff]   ;;  %362 = vst.msk [vmem:[#allocation2 + $0xd0] sm:$0xff] %vm335_vm0, %v3833_v32  ;;  %363 = vst.msk [vmem:[#allocation2 + $0xd8] sm:$0xff] %vm335_vm0, %v3833_v32  ;;  %s3836_s27 = smov [#allocation5]  }
  0x2c   : > { %3198 = vmatprep.subr.bf16.mxu0 %v3437_v4  ;;  %364 = vst.msk [vmem:[#allocation2 + $0xe0] sm:$0xff] %vm335_vm0, %v3833_v32  ;;  %365 = vst.msk [vmem:[#allocation2 + $0xe8] sm:$0xff] %vm335_vm0, %v3833_v32  ;;  %s3741_s28 = sshll.u32 %s3836_s27, 4  ;;  %s3742_s28 = int_to_ptr.vmem [resolvable:$false] %s3741_s28 }
  0x2d   : > { %366 = vst.msk [vmem:[#allocation2 + $0xf0] sm:$0xff] %vm335_vm0, %v3833_v32  ;;  %367 = vst.msk [vmem:[#allocation2 + $0xf8] sm:$0xff] %vm335_vm0, %v3833_v32  ;;  %s3743_s29 = scalar_lea.vmem %s3742_s28, 4096  ;;  %p3744_p4 = scmp.lt.s32.totalorder %s5168_s10, %s3742_s28 }
  0x2e   : > { %369 = vst.msk [vmem:[#allocation3 + $0x8] sm:$0xff] %vm335_vm0, %v3835_v58  ;;  %368 = vst.msk [vmem:[#allocation3] sm:$0xff] %vm335_vm0, %v3835_v58  ;;  %p3745_p5 = scmp.lt.s32.totalorder %s3743_s29, %s3737_s24 }
  0x2f   : > { %370 = vst.msk [vmem:[#allocation3 + $0x10] sm:$0xff] %vm335_vm0, %v3835_v58  ;;  %371 = vst.msk [vmem:[#allocation3 + $0x18] sm:$0xff] %vm335_vm0, %v3835_v58 }
  0x30   : > { %372 = vst.msk [vmem:[#allocation3 + $0x20] sm:$0xff] %vm335_vm0, %v3835_v58  ;;  %373 = vst.msk [vmem:[#allocation3 + $0x28] sm:$0xff] %vm335_vm0, %v3835_v58  ;;  %p3746_p6 = por %p3745_p5, %p3744_p4 }
  0x31   : > { %374 = vst.msk [vmem:[#allocation3 + $0x30] sm:$0xff] %vm335_vm0, %v3835_v58  ;;  %375 = vst.msk [vmem:[#allocation3 + $0x38] sm:$0xff] %vm335_vm0, %v3835_v58 }
  0x32   : > { %376 = vst.msk [vmem:[#allocation3 + $0x40] sm:$0xff] %vm335_vm0, %v3835_v58  ;;  %377 = vst.msk [vmem:[#allocation3 + $0x48] sm:$0xff] %vm335_vm0, %v3835_v58  ;;  %p3747_p7 = pnand %p3746_p6, %p3740_p2 }
  0x33   : > { %3199 = vmatpush3.bf16.xpose.msra.mxu0 %v3438_v5  ;;  %378 = vst.msk [vmem:[#allocation3 + $0x50] sm:$0xff] %vm335_vm0, %v3835_v58  ;;  %379 = vst.msk [vmem:[#allocation3 + $0x58] sm:$0xff] %vm335_vm0, %v3835_v58 }
  0x34   : > { %3200 = vmatprep.subr.bf16.mxu0 %v3439_v6  ;;  %380 = vst.msk [vmem:[#allocation3 + $0x60] sm:$0xff] %vm335_vm0, %v3835_v58  ;;  %381 = vst.msk [vmem:[#allocation3 + $0x68] sm:$0xff] %vm335_vm0, %v3835_v58 }
  0x35   : > { %382 = vst.msk [vmem:[#allocation3 + $0x70] sm:$0xff] %vm335_vm0, %v3835_v58  ;;  %383 = vst.msk [vmem:[#allocation3 + $0x78] sm:$0xff] %vm335_vm0, %v3835_v58 }
  0x36   : > { %384 = vst.msk [vmem:[#allocation3 + $0x80] sm:$0xff] %vm335_vm0, %v3835_v58  ;;  %385 = vst.msk [vmem:[#allocation3 + $0x88] sm:$0xff] %vm335_vm0, %v3835_v58 }
  0x37   : > { %386 = vst.msk [vmem:[#allocation3 + $0x90] sm:$0xff] %vm335_vm0, %v3835_v58  ;;  %387 = vst.msk [vmem:[#allocation3 + $0x98] sm:$0xff] %vm335_vm0, %v3835_v58 }
  0x38   : > { %388 = vst.msk [vmem:[#allocation3 + $0xa0] sm:$0xff] %vm335_vm0, %v3835_v58  ;;  %389 = vst.msk [vmem:[#allocation3 + $0xa8] sm:$0xff] %vm335_vm0, %v3835_v58 }
  0x39   : > { %390 = vst.msk [vmem:[#allocation3 + $0xb0] sm:$0xff] %vm335_vm0, %v3835_v58  ;;  %391 = vst.msk [vmem:[#allocation3 + $0xb8] sm:$0xff] %vm335_vm0, %v3835_v58 }
  0x3a   : > { %392 = vst.msk [vmem:[#allocation3 + $0xc0] sm:$0xff] %vm335_vm0, %v3835_v58  ;;  %393 = vst.msk [vmem:[#allocation3 + $0xc8] sm:$0xff] %vm335_vm0, %v3835_v58 }
  0x3b   : > { %3201 = vmatpush3.bf16.xpose.msra.mxu0 %v3440_v8  ;;  %394 = vst.msk [vmem:[#allocation3 + $0xd0] sm:$0xff] %vm335_vm0, %v3835_v58  ;;  %395 = vst.msk [vmem:[#allocation3 + $0xd8] sm:$0xff] %vm335_vm0, %v3835_v58 }
  0x3c   : > { %3202 = vmatprep.subr.bf16.mxu0 %v3441_v9  ;;  %396 = vst.msk [vmem:[#allocation3 + $0xe0] sm:$0xff] %vm335_vm0, %v3835_v58  ;;  %397 = vst.msk [vmem:[#allocation3 + $0xe8] sm:$0xff] %vm335_vm0, %v3835_v58 }
  0x3d   : > { %398 = vst.msk [vmem:[#allocation3 + $0xf0] sm:$0xff] %vm335_vm0, %v3835_v58  ;;  %399 = vst.msk [vmem:[#allocation3 + $0xf8] sm:$0xff] %vm335_vm0, %v3835_v58 }
  0x43   : > { %3203 = vmatpush3.bf16.xpose.msra.mxu0 %v3442_v10 }
  0x44   : > { %3204 = vmatprep.subr.bf16.mxu0 %v3443_v11 }
  0x4b   : > { %3205 = vmatpush3.bf16.xpose.msra.mxu0 %v3444_v12 }
  0x4c   : > { %3206 = vmatprep.subr.bf16.mxu0 %v3445_v13 }
  0x53   : > { %3207 = vmatpush3.bf16.xpose.msra.mxu0 %v3446_v14 }
  0x54   : > { %3208 = vmatprep.subr.bf16.mxu0 %v3447_v15 }
  0x5b   : > { %3209 = vmatpush3.bf16.xpose.msra.mxu0 %v3448_v16 }
  0x62   : > { %3211 = vmatmul.mubr.bf16.vlgmr.msra.gmra.mrb[0].mxu0 %v3449_v7 }
  0x63   : > { %3212 = vmatprep.mubr.bf16.mxu0 %v3450_v17 }
  0x6a   : > { %3213 = vmatmul.mubr.bf16.gmra.mrb[4].mxu0 %v3450_v17 }
  0x6b   : > { %3214 = vmatprep.mubr.bf16.mxu0 %v3451_v18 }
  0x72   : > { %3215 = vmatmul.mubr.bf16.gmra.mrb[8].mxu0 %v3451_v18 }
  0x73   : > { %3216 = vmatprep.mubr.bf16.mxu0 %v3452_v19 }
  0x7a   : > { %3217 = vmatmul.mubr.bf16.gmra.mrb[12].mxu0 %v3452_v19 }
  0x7b   : > { %3218 = vmatprep.mubr.bf16.mxu0 %v3453_v20 }
  0x82   : > { %3219 = vmatmul.mubr.bf16.gmra.mrb[16].mxu0 %v3453_v20 }
  0x83   : > { %3220 = vmatprep.mubr.bf16.mxu0 %v3454_v21 }
  0x8a   : > { %3221 = vmatmul.mubr.bf16.gmra.mrb[20].mxu0 %v3454_v21 }
  0x8b   : > { %3222 = vmatprep.mubr.bf16.mxu0 %v3455_v22 }
  0x92   : > { %3223 = vmatmul.mubr.bf16.gmra.mrb[24].mxu0 %v3455_v22 }
  0x93   : > { %3224 = vmatprep.mubr.bf16.mxu0 %v3456_v23 }
  0x9a   : > { %3225 = vmatmul.mubr.bf16.gmra.mrb[28].mxu0 %v3456_v23 }
  0x9b   : > { %3226 = vmatprep.mubr.bf16.mxu0 %v3457_v24 }
  0xa2   : > { %3227 = vmatmul.mubr.bf16.gmra.mrb[32].mxu0 %v3457_v24 }
  0xa3   : > { %3228 = vmatprep.mubr.bf16.mxu0 %v3458_v25 }
  0xaa   : > { %3229 = vmatmul.mubr.bf16.gmra.mrb[36].mxu0 %v3458_v25 }
  0xab   : > { %3230 = vmatprep.mubr.bf16.mxu0 %v3459_v26 }
  0xb2   : > { %3231 = vmatmul.mubr.bf16.gmra.mrb[40].mxu0 %v3459_v26 }
  0xb3   : > { %3232 = vmatprep.mubr.bf16.mxu0 %v3460_v27 }
  0xba   : > { %3233 = vmatmul.mubr.bf16.gmra.mrb[44].mxu0 %v3460_v27 }
  0xbb   : > { %3234 = vmatprep.mubr.bf16.mxu0 %v3461_v28 }
  0xc2   : > { %3235 = vmatmul.mubr.bf16.gmra.mrb[48].mxu0 %v3461_v28 }
  0xc3   : > { %3236 = vmatprep.mubr.bf16.mxu0 %v3462_v29 }
  0xca   : > { %3237 = vmatmul.mubr.bf16.gmra.mrb[52].mxu0 %v3462_v29 }
  0xcb   : > { %3238 = vmatprep.mubr.bf16.mxu0 %v3463_v30 }
  0xd2   : > { %3239 = vmatmul.mubr.bf16.gmra.mrb[56].mxu0 %v3463_v30 }
  0xd3   : > { %3240 = vmatprep.mubr.bf16.mxu0 %v3464_v31 }
  0xda   : > { %3241 = vmatmul.mubr.bf16.gmra.mrb[60].mxu0 %v3464_v31 }
 0x135   : > { %v4013_v33 = vpop.f32.mrb[0].mxu0 }
 0x136   : > { %v4015_v34 = vpop.f32.mrb[1].mxu0 }
 0x137   : > { %v4017_v35 = vpop.f32.mrb[2].mxu0  ;;  %v945_v36 = vmax.f32 %v4013_v33, %v4015_v34 }
 0x138   : > { %v4021_v37 = vpop.f32.mrb[3].mxu0 }
 0x139   : > { %946 = vmax.xlane.f32.xlu0 %v945_v36  ;;  %v948_v38 = vmax.f32 %v4017_v35, %v4021_v37 }
 0x13d   : > { %949 = vmax.xlane.f32.xlu0 %v948_v38  ;;  %v4025_v39 = vpop.f32.mrb[4].mxu0 }
 0x13e   : > { %v4027_v40 = vpop.f32.mrb[5].mxu0 }
 0x13f   : > { %v4029_v41 = vpop.f32.mrb[6].mxu0  ;;  %v951_v42 = vmax.f32 %v4025_v39, %v4027_v40 }
 0x140   : > { %v4033_v43 = vpop.f32.mrb[7].mxu0 }
 0x141   : > { %952 = vmax.xlane.f32.xlu1 %v951_v42  ;;  %v954_v44 = vmax.f32 %v4029_v41, %v4033_v43 }
 0x145   : > { %955 = vmax.xlane.f32.xlu1 %v954_v44  ;;  %v4037_v45 = vpop.f32.mrb[8].mxu0 }
 0x146   : > { %v4039_v46 = vpop.f32.mrb[9].mxu0 }
 0x147   : > { %v4041_v47 = vpop.f32.mrb[10].mxu0  ;;  %v957_v48 = vmax.f32 %v4037_v45, %v4039_v46 }
 0x148   : > { %5309 = vst [vmem:[#allocation8_spill] sm:$0xff] %v4041_v47  ;;  %v4045_v49 = vpop.f32.mrb[11].mxu0 }
 0x149   : > { %5310 = vst [vmem:[#allocation9_spill] sm:$0xff] %v4045_v49  ;;  %958 = vmax.xlane.f32.xlu0 %v957_v48  ;;  %v960_v51 = vmax.f32 %v4041_v47, %v4045_v49 }
 0x14b   : > { %961 = vmax.xlane.f32.xlu1 %v960_v51 }
 0x14d   : > { %v4049_v52 = vpop.f32.mrb[12].mxu0 }
 0x14e   : > { %5311 = vst [vmem:[#allocation10_spill] sm:$0xff] %v4049_v52  ;;  %v4051_v53 = vpop.f32.mrb[13].mxu0 }
 0x14f   : > { %5312 = vst [vmem:[#allocation11_spill] sm:$0xff] %v4051_v53  ;;  %v4053_v54 = vpop.f32.mrb[14].mxu0  ;;  %v963_v55 = vmax.f32 %v4049_v52, %v4051_v53  ;;  %v4501_v53 = vld [vmem:[#allocation2 + $0xc8] sm:$0xff]  ;;  %v4515_v52 = vld [vmem:[#allocation2 + $0xd0] sm:$0xff] }
 0x150   : > { %5313 = vst [vmem:[#allocation12_spill] sm:$0xff] %v4053_v54  ;;  %v4057_v56 = vpop.f32.mrb[15].mxu0  ;;  %5368 = vst [vmem:[#allocation67_spill] sm:$0xff] %v4501_v53 }
 0x151   : > { %5314 = vst [vmem:[#allocation13_spill] sm:$0xff] %v4057_v56  ;;  %964 = vmax.xlane.f32.xlu0 %v963_v55  ;;  %v966_v57 = vmax.f32 %v4053_v54, %v4057_v56  ;;  %5371 = vst [vmem:[#allocation70_spill] sm:$0xff] %v4515_v52 }
 0x153   : > { %967 = vmax.xlane.f32.xlu1 %v966_v57 }
 0x155   : > { %v4093_v59 = vpop.f32.mrb[16].mxu0 }
 0x156   : > { %5315 = vst [vmem:[#allocation14_spill] sm:$0xff] %v4093_v59  ;;  %v4095_v60 = vpop.f32.mrb[17].mxu0 }
 0x157   : > { %5316 = vst [vmem:[#allocation15_spill] sm:$0xff] %v4095_v60  ;;  %v4097_v61 = vpop.f32.mrb[18].mxu0  ;;  %v969_v62 = vmax.f32 %v4093_v59, %v4095_v60  ;;  %v4481_v60 = vld [vmem:[#allocation2 + $0xb8] sm:$0xff] }
 0x158   : > { %5317 = vst [vmem:[#allocation16_spill] sm:$0xff] %v4097_v61  ;;  %v4101_v63 = vpop.f32.mrb[19].mxu0  ;;  %5364 = vst [vmem:[#allocation63_spill] sm:$0xff] %v4481_v60 }
 0x159   : > { %5318 = vst [vmem:[#allocation17_spill] sm:$0xff] %v4101_v63  ;;  %970 = vmax.xlane.f32.xlu0 %v969_v62  ;;  %v972_v0 = vmax.f32 %v4097_v61, %v4101_v63 }
 0x15b   : > { %973 = vmax.xlane.f32.xlu1 %v972_v0 }
 0x15d   : > { %v4105_v1 = vpop.f32.mrb[20].mxu0 }
 0x15e   : > { %5319 = vst [vmem:[#allocation18_spill] sm:$0xff] %v4105_v1  ;;  %v4107_v2 = vpop.f32.mrb[21].mxu0 }
 0x15f   : > { %5320 = vst [vmem:[#allocation19_spill] sm:$0xff] %v4107_v2  ;;  %v4109_v3 = vpop.f32.mrb[22].mxu0  ;;  %v975_v4 = vmax.f32 %v4105_v1, %v4107_v2  ;;  %v4461_v2 = vld [vmem:[#allocation2 + $0xa8] sm:$0xff] }
 0x160   : > { %5321 = vst [vmem:[#allocation20_spill] sm:$0xff] %v4109_v3  ;;  %v4113_v5 = vpop.f32.mrb[23].mxu0 }
 0x161   : > { %5322 = vst [vmem:[#allocation21_spill] sm:$0xff] %v4113_v5  ;;  %976 = vmax.xlane.f32.xlu0 %v975_v4  ;;  %v978_v6 = vmax.f32 %v4109_v3, %v4113_v5 }
 0x163   : > { %979 = vmax.xlane.f32.xlu1 %v978_v6 }
 0x165   : > { %v4117_v7 = vpop.f32.mrb[24].mxu0 }
 0x166   : > { %5323 = vst [vmem:[#allocation22_spill] sm:$0xff] %v4117_v7  ;;  %v4119_v8 = vpop.f32.mrb[25].mxu0 }
 0x167   : > { %5324 = vst [vmem:[#allocation23_spill] sm:$0xff] %v4119_v8  ;;  %v4121_v9 = vpop.f32.mrb[26].mxu0  ;;  %v981_v10 = vmax.f32 %v4117_v7, %v4119_v8  ;;  %v4441_v8 = vld [vmem:[#allocation2 + $0x98] sm:$0xff] }
 0x168   : > { %5325 = vst [vmem:[#allocation24_spill] sm:$0xff] %v4121_v9  ;;  %v4125_v11 = vpop.f32.mrb[27].mxu0 }
 0x169   : > { %5326 = vst [vmem:[#allocation25_spill] sm:$0xff] %v4125_v11  ;;  %982 = vmax.xlane.f32.xlu0 %v981_v10  ;;  %v984_v12 = vmax.f32 %v4121_v9, %v4125_v11 }
 0x16b   : > { %985 = vmax.xlane.f32.xlu1 %v984_v12 }
 0x16d   : > { %v4129_v13 = vpop.f32.mrb[28].mxu0 }
 0x16e   : > { %5327 = vst [vmem:[#allocation26_spill] sm:$0xff] %v4129_v13  ;;  %v4131_v14 = vpop.f32.mrb[29].mxu0 }
 0x16f   : > { %5328 = vst [vmem:[#allocation27_spill] sm:$0xff] %v4131_v14  ;;  %v4133_v15 = vpop.f32.mrb[30].mxu0  ;;  %v987_v16 = vmax.f32 %v4129_v13, %v4131_v14  ;;  %v4421_v14 = vld [vmem:[#allocation2 + $0x88] sm:$0xff] }
 0x170   : > { %5329 = vst [vmem:[#allocation28_spill] sm:$0xff] %v4133_v15  ;;  %v4137_v17 = vpop.f32.mrb[31].mxu0 }
 0x171   : > { %5330 = vst [vmem:[#allocation29_spill] sm:$0xff] %v4137_v17  ;;  %988 = vmax.xlane.f32.xlu0 %v987_v16  ;;  %v990_v18 = vmax.f32 %v4133_v15, %v4137_v17 }
 0x173   : > { %991 = vmax.xlane.f32.xlu1 %v990_v18 }
 0x175   : > { %v4141_v19 = vpop.f32.mrb[32].mxu0 }
 0x176   : > { %5331 = vst [vmem:[#allocation30_spill] sm:$0xff] %v4141_v19  ;;  %v4143_v20 = vpop.f32.mrb[33].mxu0 }
 0x177   : > { %5332 = vst [vmem:[#allocation31_spill] sm:$0xff] %v4143_v20  ;;  %v4145_v21 = vpop.f32.mrb[34].mxu0  ;;  %v993_v22 = vmax.f32 %v4141_v19, %v4143_v20  ;;  %v4401_v20 = vld [vmem:[#allocation2 + $0x78] sm:$0xff] }
 0x178   : > { %5333 = vst [vmem:[#allocation32_spill] sm:$0xff] %v4145_v21  ;;  %v4149_v23 = vpop.f32.mrb[35].mxu0 }
 0x179   : > { %5334 = vst [vmem:[#allocation33_spill] sm:$0xff] %v4149_v23  ;;  %994 = vmax.xlane.f32.xlu0 %v993_v22  ;;  %v996_v24 = vmax.f32 %v4145_v21, %v4149_v23 }
 0x17b   : > { %997 = vmax.xlane.f32.xlu1 %v996_v24 }
 0x17d   : > { %v4153_v25 = vpop.f32.mrb[36].mxu0 }
 0x17e   : > { %5335 = vst [vmem:[#allocation34_spill] sm:$0xff] %v4153_v25  ;;  %v4155_v26 = vpop.f32.mrb[37].mxu0 }
 0x17f   : > { %5336 = vst [vmem:[#allocation35_spill] sm:$0xff] %v4155_v26  ;;  %v4157_v27 = vpop.f32.mrb[38].mxu0  ;;  %v999_v28 = vmax.f32 %v4153_v25, %v4155_v26  ;;  %v4381_v26 = vld [vmem:[#allocation2 + $0x68] sm:$0xff] }
 0x180   : > { %5337 = vst [vmem:[#allocation36_spill] sm:$0xff] %v4157_v27  ;;  %v4161_v29 = vpop.f32.mrb[39].mxu0 }
 0x181   : > { %5338 = vst [vmem:[#allocation37_spill] sm:$0xff] %v4161_v29  ;;  %1000 = vmax.xlane.f32.xlu0 %v999_v28  ;;  %v1002_v30 = vmax.f32 %v4157_v27, %v4161_v29 }
 0x183   : > { %1003 = vmax.xlane.f32.xlu1 %v1002_v30 }
 0x185   : > { %v4165_v31 = vpop.f32.mrb[40].mxu0 }
 0x186   : > { %5339 = vst [vmem:[#allocation38_spill] sm:$0xff] %v4165_v31  ;;  %v4167_v32 = vpop.f32.mrb[41].mxu0 }
 0x187   : > { %5340 = vst [vmem:[#allocation39_spill] sm:$0xff] %v4167_v32  ;;  %v4169_v36 = vpop.f32.mrb[42].mxu0  ;;  %v1005_v38 = vmax.f32 %v4165_v31, %v4167_v32  ;;  %v4361_v32 = vld [vmem:[#allocation2 + $0x58] sm:$0xff] }
 0x188   : > { %5341 = vst [vmem:[#allocation40_spill] sm:$0xff] %v4169_v36  ;;  %v4173_v42 = vpop.f32.mrb[43].mxu0 }
 0x189   : > { %5342 = vst [vmem:[#allocation41_spill] sm:$0xff] %v4173_v42  ;;  %1006 = vmax.xlane.f32.xlu0 %v1005_v38  ;;  %v1008_v44 = vmax.f32 %v4169_v36, %v4173_v42 }
 0x18b   : > { %1009 = vmax.xlane.f32.xlu1 %v1008_v44 }
 0x18d   : > { %v4177_v48 = vpop.f32.mrb[44].mxu0 }
 0x18e   : > { %5343 = vst [vmem:[#allocation42_spill] sm:$0xff] %v4177_v48  ;;  %v4179_v50 = vpop.f32.mrb[45].mxu0 }
 0x18f   : > { %5344 = vst [vmem:[#allocation43_spill] sm:$0xff] %v4179_v50  ;;  %v4181_v51 = vpop.f32.mrb[46].mxu0  ;;  %v1011_v55 = vmax.f32 %v4177_v48, %v4179_v50  ;;  %v4318_v50 = vld [vmem:[#allocation2 + $0x30] sm:$0xff] }
 0x190   : > { %5345 = vst [vmem:[#allocation44_spill] sm:$0xff] %v4181_v51  ;;  %v4185_v57 = vpop.f32.mrb[47].mxu0 }
 0x191   : > { %5346 = vst [vmem:[#allocation45_spill] sm:$0xff] %v4185_v57  ;;  %1012 = vmax.xlane.f32.xlu0 %v1011_v55  ;;  %v1014_v58 = vmax.f32 %v4181_v51, %v4185_v57  ;;  %v3478_v57 = vld [vmem:[%s4241_s4 + $0x30] sm:$0xff]  }
 0x193   : > { %1015 = vmax.xlane.f32.xlu1 %v1014_v58 }
 0x195   : > { %v4189_v62 = vpop.f32.mrb[48].mxu0 }
 0x196   : > { %5347 = vst [vmem:[#allocation46_spill] sm:$0xff] %v4189_v62  ;;  %v4191_v0 = vpop.f32.mrb[49].mxu0 }
 0x197   : > { %5348 = vst [vmem:[#allocation47_spill] sm:$0xff] %v4191_v0  ;;  %v4193_v4 = vpop.f32.mrb[50].mxu0  ;;  %v1017_v6 = vmax.f32 %v4189_v62, %v4191_v0  ;;  %v4290_v0 = vld [vmem:[#allocation2 + $0x20] sm:$0xff] }
 0x198   : > { %5349 = vst [vmem:[#allocation48_spill] sm:$0xff] %v4193_v4  ;;  %v4197_v10 = vpop.f32.mrb[51].mxu0 }
 0x199   : > { %5350 = vst [vmem:[#allocation49_spill] sm:$0xff] %v4197_v10  ;;  %1018 = vmax.xlane.f32.xlu0 %v1017_v6  ;;  %v1020_v12 = vmax.f32 %v4193_v4, %v4197_v10  ;;  %v4278_v10 = vld [vmem:[#allocation2 + $0x18] sm:$0xff]  ;;  %v3476_v4 = vld [vmem:[%s4241_s4 + $0x28] sm:$0xff]  }
 0x19b   : > { %1021 = vmax.xlane.f32.xlu1 %v1020_v12 }
 0x19d   : > { %v4201_v16 = vpop.f32.mrb[52].mxu0 }
 0x19e   : > { %5351 = vst [vmem:[#allocation50_spill] sm:$0xff] %v4201_v16  ;;  %v4203_v18 = vpop.f32.mrb[53].mxu0 }
 0x19f   : > { %5352 = vst [vmem:[#allocation51_spill] sm:$0xff] %v4203_v18  ;;  %v4205_v22 = vpop.f32.mrb[54].mxu0  ;;  %v1023_v24 = vmax.f32 %v4201_v16, %v4203_v18  ;;  %v3474_v16 = vld [vmem:[%s4241_s4 + $0x20] sm:$0xff]  }
 0x1a0   : > { %5353 = vst [vmem:[#allocation52_spill] sm:$0xff] %v4205_v22  ;;  %v4209_v28 = vpop.f32.mrb[55].mxu0 }
 0x1a1   : > { %5354 = vst [vmem:[#allocation53_spill] sm:$0xff] %v4209_v28  ;;  %1024 = vmax.xlane.f32.xlu0 %v1023_v24  ;;  %v1026_v30 = vmax.f32 %v4205_v22, %v4209_v28 }
 0x1a3   : > { %1027 = vmax.xlane.f32.xlu1 %v1026_v30 }
 0x1a5   : > { %v4213_v38 = vpop.f32.mrb[56].mxu0 }
 0x1a6   : > { %5355 = vst [vmem:[#allocation54_spill] sm:$0xff] %v4213_v38  ;;  %v4215_v44 = vpop.f32.mrb[57].mxu0 }
 0x1a7   : > { %5356 = vst [vmem:[#allocation55_spill] sm:$0xff] %v4215_v44  ;;  %v4217_v55 = vpop.f32.mrb[58].mxu0  ;;  %v1029_v58 = vmax.f32 %v4213_v38, %v4215_v44  ;;  %v3472_v38 = vld [vmem:[%s4241_s4 + $0x18] sm:$0xff]  }
 0x1a8   : > { %5357 = vst [vmem:[#allocation56_spill] sm:$0xff] %v4217_v55  ;;  %v4221_v6 = vpop.f32.mrb[59].mxu0 }
 0x1a9   : > { %5358 = vst [vmem:[#allocation57_spill] sm:$0xff] %v4221_v6  ;;  %1030 = vmax.xlane.f32.xlu0 %v1029_v58  ;;  %v1032_v12 = vmax.f32 %v4217_v55, %v4221_v6  ;;  %v3465_v58 = vld [vmem:[%s4241_s4 + $0x40] sm:$0xff]   ;;  %v3470_v6 = vld [vmem:[%s4241_s4 + $0x10] sm:$0xff]  }
 0x1aa   : > { %3242 = vmatprep.subr.bf16.mxu1 %v3465_v58  ;;  %v3473_v58 = vld [vmem:[%s4241_s4 + $0x60] sm:$0xff]  }
 0x1ab   : > { %1033 = vmax.xlane.f32.xlu1 %v1032_v12  ;;  %v3466_v12 = vld [vmem:[%s4241_s4] sm:$0xff]  }
 0x1ac   : > { %3243 = vmatpush3.bf16.msra.mxu1 %v3466_v12  ;;  %v3471_v12 = vld [vmem:[%s4241_s4 + $0x58] sm:$0xff]  }
 0x1ad   : > { %v4225_v24 = vpop.f32.mrb[60].mxu0 }
 0x1ae   : > { %5359 = vst [vmem:[#allocation58_spill] sm:$0xff] %v4225_v24  ;;  %v4227_v30 = vpop.f32.mrb[61].mxu0 }
 0x1af   : > { %5360 = vst [vmem:[#allocation59_spill] sm:$0xff] %v4227_v30  ;;  %v4229_v28 = vpop.f32.mrb[62].mxu0  ;;  %v1035_v22 = vmax.f32 %v4225_v24, %v4227_v30  ;;  %v3467_v30 = vld [vmem:[%s4241_s4 + $0x48] sm:$0xff]  }
 0x1b0   : > { %5361 = vst [vmem:[#allocation60_spill] sm:$0xff] %v4229_v28  ;;  %v4233_v18 = vpop.f32.mrb[63].mxu0  ;;  %3244 = vmatprep.subr.bf16.mxu1 %v3467_v30  ;;  %v4250_v24 = vld [vmem:[#allocation2 + $0x8] sm:$0xff] }
 0x1b1   : > { %5362 = vst [vmem:[#allocation61_spill] sm:$0xff] %v4233_v18  ;;  %v1038_v44 = vmax.f32 %v4229_v28, %v4233_v18  ;;  %1036 = vmax.xlane.f32.xlu0 %v1035_v22  ;;  %v4246_v18 = vld [vmem:[#allocation2] sm:$0xff]  ;;  %v3468_v22 = vld [vmem:[%s4241_s4 + $0x8] sm:$0xff]  }
 0x1b2   : > { %3245 = vmatpush3.bf16.msra.mxu1 %v3468_v22 }
 0x1b3   : > { %1039 = vmax.xlane.f32.xlu1 %v1038_v44  ;;  %v3469_v44 = vld [vmem:[%s4241_s4 + $0x50] sm:$0xff]  }
 0x1b4   : > { %3246 = vmatprep.subr.bf16.mxu1 %v3469_v44  ;;  %v3475_v44 = vld [vmem:[%s4241_s4 + $0x68] sm:$0xff]  }
 0x1b6   : > { %3247 = vmatpush3.bf16.msra.mxu1 %v3470_v6 }
 0x1b7   : > { %3248 = vmatprep.subr.bf16.mxu1 %v3471_v12  ;;  %v4297_v12 = vld [vmem:[#allocation2 + $0x28] sm:$0xff] }
 0x1ba   : > { %3249 = vmatpush3.bf16.msra.mxu1 %v3472_v38 }
 0x1bb   : > { %3250 = vmatprep.subr.bf16.mxu1 %v3473_v58 }
 0x1be   : > { %3251 = vmatpush3.bf16.msra.mxu1 %v3474_v16 }
 0x1bf   : > { %3252 = vmatprep.subr.bf16.mxu1 %v3475_v44 }
 0x1c2   : > { %3253 = vmatpush3.bf16.msra.mxu1 %v3476_v4  ;;  %v3479_v4 = vld [vmem:[%s4241_s4 + $0x78] sm:$0xff]  }
 0x1c6   : > { %v947_v28 = vpop.xlane.xlu0 %946 }
 0x1c7   : > { %v4254_v55 = vmax.f32 %v4246_v18, %v947_v28  ;;  %v4266_v28 = vld [vmem:[#allocation2 + $0x10] sm:$0xff] }
 0x1c9   : > { %2323 = vst.msk [vmem:[#allocation2] sm:$0xff] %vm335_vm0, %v4254_v55  ;;  %1171 = vperm.xlu0 %3431, %v4254_v55  }
 0x1ca   : > { %v950_v30 = vpop.xlane.xlu0 %949 }
 0x1cb   : > { %v4263_v22 = vmax.f32 %v4250_v24, %v950_v30 }
 0x1cd   : > { %2324 = vst.msk [vmem:[#allocation2 + $0x8] sm:$0xff] %vm335_vm0, %v4263_v22  ;;  %1176 = vperm.xlu1 %3432, %v4263_v22  }
 0x1ce   : > { %v953_v6 = vpop.xlane.xlu1 %952 }
 0x1cf   : > { %v4275_v30 = vmax.f32 %v4266_v28, %v953_v6 }
 0x1d1   : > { %2325 = vst.msk [vmem:[#allocation2 + $0x10] sm:$0xff] %vm335_vm0, %v4275_v30  ;;  %1181 = vperm.xlu1 %3432, %v4275_v30  }
 0x1d2   : > { %v956_v38 = vpop.xlane.xlu1 %955 }
 0x1d3   : > { %v4287_v6 = vmax.f32 %v4278_v10, %v956_v38  ;;  %v3477_v38 = vld [vmem:[%s4241_s4 + $0x70] sm:$0xff]  }
 0x1d4   : > { %3254 = vmatprep.subr.bf16.mxu1 %v3477_v38  ;;  %v3480_v38 = vld [vmem:[%s4241_s4 + $0x38] sm:$0xff]  }
 0x1d5   : > { %2326 = vst.msk [vmem:[#allocation2 + $0x18] sm:$0xff] %vm335_vm0, %v4287_v6  ;;  %1186 = vperm.xlu1 %3432, %v4287_v6   ;;  %3255 = vmatpush3.bf16.msra.mxu1 %v3478_v57 }
 0x1d6   : > { %v959_v16 = vpop.xlane.xlu0 %958  ;;  %3256 = vmatprep.subr.bf16.mxu1 %v3479_v4 }
 0x1d7   : > { %v4301_v62 = vmax.f32 %v4290_v0, %v959_v16  ;;  %v4341_v16 = vld [vmem:[#allocation2 + $0x48] sm:$0xff] }
 0x1d8   : > { %v962_v44 = vpop.xlane.xlu1 %961 }
 0x1d9   : > { %2327 = vst.msk [vmem:[#allocation2 + $0x20] sm:$0xff] %vm335_vm0, %v4301_v62  ;;  %v4309_v51 = vmax.f32 %v4297_v12, %v962_v44  ;;  %1191 = vperm.xlu1 %3432, %v4301_v62   ;;  %3257 = vmatpush3.bf16.msra.mxu1 %v3480_v38  ;;  %v4321_v44 = vld [vmem:[#allocation2 + $0x38] sm:$0xff] }
 0x1db   : > { %2328 = vst.msk [vmem:[#allocation2 + $0x28] sm:$0xff] %vm335_vm0, %v4309_v51 }
 0x1dd   : > { %1196 = vperm.xlu1 %3432, %v4309_v51  }
 0x1de   : > { %v965_v58 = vpop.xlane.xlu0 %964 }
 0x1df   : > { %v4324_v48 = vmax.f32 %v4318_v50, %v965_v58  ;;  %v4338_v58 = vld [vmem:[#allocation2 + $0x40] sm:$0xff] }
 0x1e0   : > { %v968_v57 = vpop.xlane.xlu1 %967 }
 0x1e1   : > { %2329 = vst.msk [vmem:[#allocation2 + $0x30] sm:$0xff] %vm335_vm0, %v4324_v48  ;;  %v4331_v42 = vmax.f32 %v4321_v44, %v968_v57  ;;  %1201 = vperm.xlu1 %3432, %v4324_v48  }
 0x1e3   : > { %2330 = vst.msk [vmem:[#allocation2 + $0x38] sm:$0xff] %vm335_vm0, %v4331_v42 }
 0x1e5   : > { %1206 = vperm.xlu1 %3432, %v4331_v42  }
 0x1e6   : > { %v971_v38 = vpop.xlane.xlu0 %970 }
 0x1e7   : > { %v4344_v36 = vmax.f32 %v4338_v58, %v971_v38  ;;  %v4359_v38 = vld [vmem:[#allocation2 + $0x50] sm:$0xff] }
 0x1e8   : > { %v974_v57 = vpop.xlane.xlu1 %973 }
 0x1e9   : > { %2331 = vst.msk [vmem:[#allocation2 + $0x40] sm:$0xff] %vm335_vm0, %v4344_v36  ;;  %v4351_v4 = vmax.f32 %v4341_v16, %v974_v57  ;;  %1211 = vperm.xlu1 %3432, %v4344_v36  }
 0x1eb   : > { %2332 = vst.msk [vmem:[#allocation2 + $0x48] sm:$0xff] %vm335_vm0, %v4351_v4  ;;  %1216 = vperm.xlu0 %3431, %v4351_v4  }
 0x1ee   : > { %v977_v29 = vpop.xlane.xlu0 %976 }
 0x1ef   : > { %v4364_v27 = vmax.f32 %v4359_v38, %v977_v29  ;;  %v4379_v29 = vld [vmem:[#allocation2 + $0x60] sm:$0xff] }
 0x1f0   : > { %v980_v57 = vpop.xlane.xlu1 %979 }
 0x1f1   : > { %2333 = vst.msk [vmem:[#allocation2 + $0x50] sm:$0xff] %vm335_vm0, %v4364_v27  ;;  %v4371_v31 = vmax.f32 %v4361_v32, %v980_v57  ;;  %1221 = vperm.xlu1 %3432, %v4364_v27  }
 0x1f3   : > { %2334 = vst.msk [vmem:[#allocation2 + $0x58] sm:$0xff] %vm335_vm0, %v4371_v31  ;;  %1226 = vperm.xlu0 %3431, %v4371_v31  }
 0x1f6   : > { %v983_v23 = vpop.xlane.xlu0 %982 }
 0x1f7   : > { %v4384_v21 = vmax.f32 %v4379_v29, %v983_v23  ;;  %v4399_v23 = vld [vmem:[#allocation2 + $0x70] sm:$0xff] }
 0x1f8   : > { %v986_v57 = vpop.xlane.xlu1 %985 }
 0x1f9   : > { %2335 = vst.msk [vmem:[#allocation2 + $0x60] sm:$0xff] %vm335_vm0, %v4384_v21  ;;  %v4391_v25 = vmax.f32 %v4381_v26, %v986_v57  ;;  %1231 = vperm.xlu1 %3432, %v4384_v21  }
 0x1fb   : > { %2336 = vst.msk [vmem:[#allocation2 + $0x68] sm:$0xff] %vm335_vm0, %v4391_v25  ;;  %1236 = vperm.xlu0 %3431, %v4391_v25  }
 0x1fe   : > { %v989_v17 = vpop.xlane.xlu0 %988 }
 0x1ff   : > { %v4404_v15 = vmax.f32 %v4399_v23, %v989_v17  ;;  %v4419_v17 = vld [vmem:[#allocation2 + $0x80] sm:$0xff] }
 0x200   : > { %v992_v57 = vpop.xlane.xlu1 %991 }
 0x201   : > { %2337 = vst.msk [vmem:[#allocation2 + $0x70] sm:$0xff] %vm335_vm0, %v4404_v15  ;;  %v4411_v19 = vmax.f32 %v4401_v20, %v992_v57  ;;  %1241 = vperm.xlu1 %3432, %v4404_v15  }
 0x203   : > { %2338 = vst.msk [vmem:[#allocation2 + $0x78] sm:$0xff] %vm335_vm0, %v4411_v19  ;;  %1246 = vperm.xlu0 %3431, %v4411_v19  }
 0x206   : > { %v995_v11 = vpop.xlane.xlu0 %994 }
 0x207   : > { %v4424_v9 = vmax.f32 %v4419_v17, %v995_v11  ;;  %v4439_v11 = vld [vmem:[#allocation2 + $0x90] sm:$0xff] }
 0x208   : > { %v998_v57 = vpop.xlane.xlu1 %997 }
 0x209   : > { %2339 = vst.msk [vmem:[#allocation2 + $0x80] sm:$0xff] %vm335_vm0, %v4424_v9  ;;  %v4431_v13 = vmax.f32 %v4421_v14, %v998_v57  ;;  %1251 = vperm.xlu1 %3432, %v4424_v9  }
 0x20b   : > { %2340 = vst.msk [vmem:[#allocation2 + $0x88] sm:$0xff] %vm335_vm0, %v4431_v13  ;;  %1256 = vperm.xlu0 %3431, %v4431_v13  }
 0x20e   : > { %v1001_v5 = vpop.xlane.xlu0 %1000 }
 0x20f   : > { %v4444_v3 = vmax.f32 %v4439_v11, %v1001_v5  ;;  %v4459_v5 = vld [vmem:[#allocation2 + $0xa0] sm:$0xff] }
 0x210   : > { %v1004_v57 = vpop.xlane.xlu1 %1003 }
 0x211   : > { %2341 = vst.msk [vmem:[#allocation2 + $0x90] sm:$0xff] %vm335_vm0, %v4444_v3  ;;  %v4451_v7 = vmax.f32 %v4441_v8, %v1004_v57  ;;  %1261 = vperm.xlu1 %3432, %v4444_v3  }
 0x213   : > { %2342 = vst.msk [vmem:[#allocation2 + $0x98] sm:$0xff] %vm335_vm0, %v4451_v7  ;;  %1266 = vperm.xlu0 %3431, %v4451_v7  }
 0x216   : > { %v1007_v63 = vpop.xlane.xlu0 %1006 }
 0x217   : > { %v4464_v61 = vmax.f32 %v4459_v5, %v1007_v63  ;;  %v4479_v63 = vld [vmem:[#allocation2 + $0xb0] sm:$0xff] }
 0x218   : > { %v1010_v57 = vpop.xlane.xlu1 %1009  ;;  %5363 = vst [vmem:[#allocation62_spill] sm:$0xff] %v4479_v63 }
 0x219   : > { %2343 = vst.msk [vmem:[#allocation2 + $0xa0] sm:$0xff] %vm335_vm0, %v4464_v61  ;;  %v4471_v1 = vmax.f32 %v4461_v2, %v1010_v57  ;;  %1271 = vperm.xlu1 %3432, %v4464_v61  }
 0x21b   : > { %2344 = vst.msk [vmem:[#allocation2 + $0xa8] sm:$0xff] %vm335_vm0, %v4471_v1  ;;  %1276 = vperm.xlu0 %3431, %v4471_v1  }
 0x21e   : > { %v1013_v56 = vpop.xlane.xlu0 %1012 }
 0x21f   : > { %v4484_v54 = vmax.f32 %v4479_v63, %v1013_v56  ;;  %v4499_v56 = vld [vmem:[#allocation2 + $0xc0] sm:$0xff] }
 0x220   : > { %v1016_v57 = vpop.xlane.xlu1 %1015  ;;  %5367 = vst [vmem:[#allocation66_spill] sm:$0xff] %v4499_v56 }
 0x221   : > { %5365 = vst [vmem:[#allocation64_spill] sm:$0xff] %v4484_v54  ;;  %2345 = vst.msk [vmem:[#allocation2 + $0xb0] sm:$0xff] %vm335_vm0, %v4484_v54  ;;  %v4491_v59 = vmax.f32 %v4481_v60, %v1016_v57  ;;  %1281 = vperm.xlu1 %3432, %v4484_v54   ;;  %v4517_v60 = vld [vmem:[#allocation2 + $0xd8] sm:$0xff] }
 0x222   : > { %5372 = vst [vmem:[#allocation71_spill] sm:$0xff] %v4517_v60 }
 0x223   : > { %5366 = vst [vmem:[#allocation65_spill] sm:$0xff] %v4491_v59  ;;  %2346 = vst.msk [vmem:[#allocation2 + $0xb8] sm:$0xff] %vm335_vm0, %v4491_v59  ;;  %1286 = vperm.xlu0 %3431, %v4491_v59  }
 0x226   : > { %v1019_v49 = vpop.xlane.xlu0 %1018 }
 0x227   : > { %v4504_v47 = vmax.f32 %v4499_v56, %v1019_v49 }
 0x228   : > { %v1022_v57 = vpop.xlane.xlu1 %1021 }
 0x229   : > { %5369 = vst [vmem:[#allocation68_spill] sm:$0xff] %v4504_v47  ;;  %2347 = vst.msk [vmem:[#allocation2 + $0xc0] sm:$0xff] %vm335_vm0, %v4504_v47  ;;  %v4509_v54 = vmax.f32 %v4501_v53, %v1022_v57  ;;  %1291 = vperm.xlu1 %3432, %v4504_v47   ;;  %v4531_v53 = vld [vmem:[#allocation2 + $0xe0] sm:$0xff]  ;;  %v4536_v47 = vld [vmem:[#allocation2 + $0xe8] sm:$0xff] }
 0x22b   : > { %5370 = vst [vmem:[#allocation69_spill] sm:$0xff] %v4509_v54  ;;  %2348 = vst.msk [vmem:[#allocation2 + $0xc8] sm:$0xff] %vm335_vm0, %v4509_v54  ;;  %1296 = vperm.xlu0 %3431, %v4509_v54  }
 0x22e   : > { %v1025_v59 = vpop.xlane.xlu0 %1024 }
 0x22f   : > { %v4520_v49 = vmax.f32 %v4515_v52, %v1025_v59  ;;  %v5375_v59 = vsub.f32 %v4250_v24, %v4263_v22  ;;  %v5377_v24 = vsub.f32 %v4266_v28, %v4275_v30  ;;  %v4564_v28 = vld [vmem:[#allocation2 + $0xf8] sm:$0xff] }
 0x230   : > { %v1028_v56 = vpop.xlane.xlu1 %1027 }
 0x231   : > { %5373 = vst [vmem:[#allocation72_spill] sm:$0xff] %v4520_v49  ;;  %2349 = vst.msk [vmem:[#allocation2 + $0xd0] sm:$0xff] %vm335_vm0, %v4520_v49  ;;  %v4525_v57 = vmax.f32 %v4517_v60, %v1028_v56  ;;  %1301 = vperm.xlu1 %3432, %v4520_v49   ;;  %v1107_v52 = vmul.f32 1.442695, %v5375_v59  ;;  %v5376_v56 = vsub.f32 %v4246_v18, %v4254_v55  ;;  %v1109_v22 = vmul.f32 1.442695, %v5377_v24 }
 0x232   : > { %v4559_v55 = vld [vmem:[#allocation2 + $0xf0] sm:$0xff] }
 0x233   : > { %5374 = vst [vmem:[#allocation73_spill] sm:$0xff] %v4525_v57  ;;  %2350 = vst.msk [vmem:[#allocation2 + $0xd8] sm:$0xff] %vm335_vm0, %v4525_v57  ;;  %1306 = vperm.xlu0 %3431, %v4525_v57   ;;  %v1105_v60 = vmul.f32 1.442695, %v5376_v56  ;;  %3481 = vpow2.f32 %v1107_v52  ;;  %v5379_v52 = vsub.f32 %v4290_v0, %v4301_v62  ;;  %v5382_v0 = vsub.f32 %v4321_v44, %v4331_v42 }
 0x235   : > { %3483 = vpow2.f32 %v1105_v60  ;;  %v5380_v60 = vsub.f32 %v4297_v12, %v4309_v51  ;;  %v5383_v51 = vsub.f32 %v4338_v58, %v4344_v36  ;;  %v5385_v36 = vsub.f32 %v4359_v38, %v4364_v27 }
 0x236   : > { %v1031_v54 = vpop.xlane.xlu0 %1030  ;;  %3485 = vpow2.f32 %v1109_v22  ;;  %v1119_v22 = vmul.f32 1.442695, %v5382_v0  ;;  %v5388_v27 = vsub.f32 %v4381_v26, %v4391_v25  ;;  %v5391_v0 = vsub.f32 %v4419_v17, %v4424_v9 }
 0x237   : > { %v4539_v63 = vmax.f32 %v4531_v53, %v1031_v54  ;;  %v5378_v54 = vsub.f32 %v4278_v10, %v4287_v6  ;;  %v1115_v56 = vmul.f32 1.442695, %v5380_v60  ;;  %v5381_v6 = vsub.f32 %v4318_v50, %v4324_v48 }
 0x238   : > { %v1034_v49 = vpop.xlane.xlu1 %1033  ;;  %v1121_v12 = vmul.f32 1.442695, %v5383_v51  ;;  %v1125_v44 = vmul.f32 1.442695, %v5385_v36  ;;  %v1131_v38 = vmul.f32 1.442695, %v5388_v27 }
 0x239   : > { %2351 = vst.msk [vmem:[#allocation2 + $0xe0] sm:$0xff] %vm335_vm0, %v4539_v63  ;;  %v4547_v57 = vmax.f32 %v4536_v47, %v1034_v49  ;;  %1311 = vperm.xlu1 %3432, %v4539_v63   ;;  %v1111_v18 = vmul.f32 1.442695, %v5378_v54  ;;  %v1113_v49 = vmul.f32 1.442695, %v5379_v52  ;;  %v5384_v54 = vsub.f32 %v4341_v16, %v4351_v4 }
 0x23a   : > { %v1117_v24 = vmul.f32 1.442695, %v5381_v6 }
 0x23b   : > { %2352 = vst.msk [vmem:[#allocation2 + $0xe8] sm:$0xff] %vm335_vm0, %v4547_v57  ;;  %1316 = vperm.xlu0 %3431, %v4547_v57   ;;  %3487 = vpow2.f32 %v1111_v18  ;;  %v1123_v42 = vmul.f32 1.442695, %v5384_v54  ;;  %v5386_v18 = vsub.f32 %v4361_v32, %v4371_v31 }
 0x23c   : > { %3489 = vpow2.f32 %v1113_v49  ;;  %v5387_v49 = vsub.f32 %v4379_v29, %v4384_v21  ;;  %v5389_v21 = vsub.f32 %v4399_v23, %v4404_v15 }
 0x23d   : > { %v4592_v50 = vpop.eup %3481  ;;  %3491 = vpow2.f32 %v1115_v56  ;;  %v1127_v52 = vmul.f32 1.442695, %v5386_v18 }
 0x23e   : > { %v1037_v59 = vpop.xlane.xlu0 %1036  ;;  %3493 = vpow2.f32 %v1117_v24  ;;  %v1129_v16 = vmul.f32 1.442695, %v5387_v49  ;;  %v1133_v29 = vmul.f32 1.442695, %v5389_v21 }
 0x23f   : > { %v4567_v30 = vmax.f32 %v4559_v55, %v1037_v59  ;;  %v4601_v58 = vpop.eup %3483  ;;  %3495 = vpow2.f32 %v1119_v22  ;;  %v1137_v22 = vmul.f32 1.442695, %v5391_v0  ;;  %v5401_v0 = vld [vmem:[#allocation66_spill] sm:$0xff] }
 0x240   : > { %v1040_v10 = vpop.xlane.xlu1 %1039  ;;  %3497 = vpow2.f32 %v1121_v12  ;;  %v4610_v4 = vpop.eup %3485 }
 0x241   : > { %2353 = vst.msk [vmem:[#allocation2 + $0xf0] sm:$0xff] %vm335_vm0, %v4567_v30  ;;  %v4578_v62 = vmax.f32 %v4564_v28, %v1040_v10  ;;  %1321 = vperm.xlu1 %3432, %v4567_v30   ;;  %3499 = vpow2.f32 %v1123_v42 }
 0x242   : > { %3501 = vpow2.f32 %v1125_v44 }
 0x243   : > { %2354 = vst.msk [vmem:[#allocation2 + $0xf8] sm:$0xff] %vm335_vm0, %v4578_v62  ;;  %1326 = vperm.xlu0 %3431, %v4578_v62   ;;  %3503 = vpow2.f32 %v1127_v52 }
 0x244   : > { %3505 = vpow2.f32 %v1129_v16 }
 0x245   : > { %1785 = vperm.xlu1 %3432, %v4592_v50   ;;  %v4618_v32 = vpop.eup %3487  ;;  %3507 = vpow2.f32 %v1131_v38 }
 0x246   : > { %v4624_v25 = vpop.eup %3489 }
 0x247   : > { %1780 = vperm.xlu0 %3431, %v4601_v58   ;;  %v4632_v15 = vpop.eup %3491 }
 0x248   : > { %v1172_v59 = vpop.permute.xlu0 %1171  ;;  %v4634_v23 = vpop.eup %3493 }
 0x249   : > { %v1329_v60 = vsub.f32 %v4013_v33, %v1172_v59  ;;  %v1330_v31 = vsub.f32 %v4015_v34, %v1172_v59  ;;  %1790 = vperm.xlu1 %3432, %v4610_v4   ;;  %v5390_v33 = vsub.f32 %v4401_v20, %v4411_v19  ;;  %v4640_v51 = vpop.eup %3495  ;;  %v5395_v59 = vsub.f32 %v4459_v5, %v4464_v61 }
 0x24a   : > { %v4645_v54 = vpop.eup %3497 }
 0x24b   : > { %v1393_v56 = vmul.f32 1.442695, %v1329_v60  ;;  %v1395_v10 = vmul.f32 1.442695, %v1330_v31  ;;  %1795 = vperm.xlu0 %3431, %v4618_v32   ;;  %v1135_v34 = vmul.f32 1.442695, %v5390_v33  ;;  %v4650_v17 = vpop.eup %3499 }
 0x24c   : > { %v1177_v26 = vpop.permute.xlu1 %1176  ;;  %v4652_v36 = vpop.eup %3501 }
 0x24d   : > { %3509 = vpow2.f32 %v1393_v56  ;;  %v1331_v6 = vsub.f32 %v4017_v35, %v1177_v26  ;;  %v1332_v24 = vsub.f32 %v4021_v37, %v1177_v26  ;;  %1800 = vperm.xlu1 %3432, %v4624_v25   ;;  %v5392_v35 = vsub.f32 %v4421_v14, %v4431_v13  ;;  %v4658_v52 = vpop.eup %3503  ;;  %v5397_v26 = vld [vmem:[#allocation62_spill] sm:$0xff] }
 0x24e   : > { %3511 = vpow2.f32 %v1395_v10  ;;  %v5393_v13 = vsub.f32 %v4439_v11, %v4444_v3  ;;  %v4663_v16 = vpop.eup %3505 }
 0x24f   : > { %3513 = vpow2.f32 %v1133_v29  ;;  %v1397_v19 = vmul.f32 1.442695, %v1331_v6  ;;  %v1399_v20 = vmul.f32 1.442695, %v1332_v24  ;;  %1805 = vperm.xlu0 %3431, %v4632_v15   ;;  %v1139_v37 = vmul.f32 1.442695, %v5392_v35  ;;  %v4668_v11 = vpop.eup %3507 }
 0x250   : > { %3515 = vpow2.f32 %v1135_v34  ;;  %v1182_v12 = vpop.permute.xlu1 %1181  ;;  %v1141_v14 = vmul.f32 1.442695, %v5393_v13  ;;  %v5398_v6 = vld [vmem:[#allocation64_spill] sm:$0xff] }
 0x251   : > { %3517 = vpow2.f32 %v1397_v19  ;;  %v1333_v42 = vsub.f32 %v4025_v39, %v1182_v12  ;;  %v1334_v9 = vsub.f32 %v4027_v40, %v1182_v12  ;;  %1810 = vperm.xlu1 %3432, %v4634_v23   ;;  %v5394_v39 = vsub.f32 %v4441_v8, %v4451_v7 }
 0x252   : > { %3519 = vpow2.f32 %v1399_v20  ;;  %v1145_v7 = vmul.f32 1.442695, %v5395_v59 }
 0x253   : > { %3521 = vpow2.f32 %v1137_v22  ;;  %v1401_v44 = vmul.f32 1.442695, %v1333_v42  ;;  %v1403_v18 = vmul.f32 1.442695, %v1334_v9  ;;  %1815 = vperm.xlu0 %3431, %v4640_v51   ;;  %v1143_v40 = vmul.f32 1.442695, %v5394_v39 }
 0x254   : > { %3523 = vpow2.f32 %v1139_v37  ;;  %v1187_v49 = vpop.permute.xlu1 %1186  ;;  %v5402_v37 = vld [vmem:[#allocation8_spill] sm:$0xff]  ;;  %v5403_v42 = vld [vmem:[#allocation9_spill] sm:$0xff]  ;;  %v5404_v39 = vld [vmem:[#allocation63_spill] sm:$0xff] }
 0x255   : > { %3525 = vpow2.f32 %v1401_v44  ;;  %v1335_v27 = vsub.f32 %v4029_v41, %v1187_v49  ;;  %v1336_v3 = vsub.f32 %v4033_v43, %v1187_v49  ;;  %1820 = vperm.xlu1 %3432, %v4645_v54   ;;  %v5396_v41 = vsub.f32 %v4461_v2, %v4471_v1 }
 0x256   : > { %3527 = vpow2.f32 %v1403_v18 }
 0x257   : > { %v3510_v38 = vpop.eup %3509  ;;  %3529 = vpow2.f32 %v1141_v14  ;;  %v1405_v8 = vmul.f32 1.442695, %v1335_v27  ;;  %v1407_v60 = vmul.f32 1.442695, %v1336_v3  ;;  %1825 = vperm.xlu0 %3431, %v4650_v17   ;;  %v1147_v43 = vmul.f32 1.442695, %v5396_v41 }
 0x258   : > { %v3512_v31 = vpop.eup %3511  ;;  %3531 = vpow2.f32 %v1143_v40  ;;  %v1192_v21 = vpop.permute.xlu1 %1191  ;;  %v5405_v40 = vld [vmem:[#allocation65_spill] sm:$0xff]  ;;  %v5409_v41 = vld [vmem:[#allocation72_spill] sm:$0xff] }
 0x259   : > { %v4677_v29 = vpop.eup %3513  ;;  %3533 = vpow2.f32 %v1405_v8  ;;  %v1337_v56 = vsub.f32 %v4037_v45, %v1192_v21  ;;  %v1338_v10 = vsub.f32 %v4039_v46, %v1192_v21  ;;  %1830 = vperm.xlu1 %3432, %v4652_v36   ;;  %v4682_v61 = vadd.f32 %v3512_v31, %v3510_v38  ;;  %v5400_v46 = vld [vmem:[#allocation68_spill] sm:$0xff]  ;;  %v5407_v3 = vld [vmem:[#allocation69_spill] sm:$0xff] }
 0x25a   : > { %v4684_v5 = vpop.eup %3515  ;;  %3535 = vpow2.f32 %v1407_v60  ;;  %v5399_v45 = vsub.f32 %v5397_v26, %v5398_v6  ;;  %v1097_v22 = vsub.f32 %v5401_v0, %v5400_v46  ;;  %v5406_v49 = vsub.f32 %v5404_v39, %v5405_v40  ;;  %v5415_v39 = vld [vmem:[#allocation12_spill] sm:$0xff] }
 0x25b   : > { %v3518_v33 = vpop.eup %3517  ;;  %3537 = vpow2.f32 %v1145_v7  ;;  %v1409_v34 = vmul.f32 1.442695, %v1337_v56  ;;  %v1411_v1 = vmul.f32 1.442695, %v1338_v10  ;;  %1835 = vperm.xlu0 %3431, %v4658_v52  }
 0x25c   : > { %v3520_v2 = vpop.eup %3519  ;;  %3539 = vpow2.f32 %v1147_v43  ;;  %v1149_v24 = vmul.f32 1.442695, %v5399_v45  ;;  %v1197_v19 = vpop.permute.xlu1 %1196  ;;  %v1970_v20 = vpack.c.bf16 %v3518_v33, %v3510_v38  ;;  %v1151_v27 = vmul.f32 1.442695, %v5406_v49  ;;  %v5408_v38 = vld [vmem:[#allocation67_spill] sm:$0xff]  ;;  %v5410_v43 = vld [vmem:[#allocation70_spill] sm:$0xff] }
 0x25d   : > { %v4692_v35 = vpop.eup %3521  ;;  %3541 = vpow2.f32 %v1409_v34  ;;  %v1339_v12 = vsub.f32 %v5402_v37, %v1197_v19  ;;  %v1340_v9 = vsub.f32 %v5403_v42, %v1197_v19  ;;  %1840 = vperm.xlu1 %3432, %v4663_v16   ;;  %v1971_v13 = vpack.c.bf16 %v3520_v2, %v3512_v31  ;;  %v5414_v37 = vld [vmem:[#allocation71_spill] sm:$0xff]  ;;  %v5416_v49 = vld [vmem:[#allocation13_spill] sm:$0xff] }
 0x25e   : > { %v4697_v14 = vpop.eup %3523  ;;  %3543 = vpow2.f32 %v1411_v1  ;;  %v4699_v44 = vadd.f32 %v3520_v2, %v3518_v33  ;;  %v1098_v59 = vsub.f32 %v5408_v38, %v5407_v3  ;;  %v1153_v31 = vmul.f32 1.442695, %v1097_v22  ;;  %v5411_v33 = vld [vmem:[#allocation10_spill] sm:$0xff]  ;;  %v5412_v1 = vld [vmem:[#allocation11_spill] sm:$0xff] }
 0x25f   : > { %v3526_v18 = vpop.eup %3525  ;;  %v1413_v7 = vmul.f32 1.442695, %v1339_v12  ;;  %v1415_v8 = vmul.f32 1.442695, %v1340_v9  ;;  %2130 = vmatprep.mubr.bf16.mxu1 %v1971_v13  ;;  %1845 = vperm.xlu0 %3431, %v4668_v11   ;;  %3545 = vpow2.f32 %v1149_v24  ;;  %v1099_v21 = vsub.f32 %v5410_v43, %v5409_v41 }
 0x260   : > { %v3528_v60 = vpop.eup %3527  ;;  %2131 = vmatmul.mubr.bf16.vlgmr.msra.gmra.mrb[0].mxu1 %v1970_v20  ;;  %v1202_v56 = vpop.permute.xlu1 %1201  ;;  %v1155_v24 = vmul.f32 1.442695, %v1098_v59  ;;  %v5413_v20 = vld [vmem:[#allocation73_spill] sm:$0xff]  ;;  %v1101_v43 = vsub.f32 %v4531_v53, %v4539_v63 }
 0x261   : > { %v4709_v10 = vpop.eup %3529  ;;  %3547 = vpow2.f32 %v1413_v7  ;;  %v1341_v34 = vsub.f32 %v5411_v33, %v1202_v56  ;;  %v1342_v2 = vsub.f32 %v5412_v1, %v1202_v56  ;;  %1850 = vperm.xlu1 %3432, %v4677_v29   ;;  %v4714_v26 = vadd.f32 %v3528_v60, %v3526_v18  ;;  %v5418_v33 = vld [vmem:[#allocation15_spill] sm:$0xff] }
 0x262   : > { %v4716_v6 = vpop.eup %3531  ;;  %3549 = vpow2.f32 %v1415_v8  ;;  %v1157_v19 = vmul.f32 1.442695, %v1099_v21  ;;  %v1100_v12 = vsub.f32 %v5414_v37, %v5413_v20  ;;  %v5417_v21 = vld [vmem:[#allocation14_spill] sm:$0xff] }
 0x263   : > { %v3534_v45 = vpop.eup %3533  ;;  %3551 = vpow2.f32 %v1151_v27  ;;  %v1417_v46 = vmul.f32 1.442695, %v1341_v34  ;;  %v1419_v0 = vmul.f32 1.442695, %v1342_v2  ;;  %1855 = vperm.xlu0 %3431, %v4684_v5  }
 0x264   : > { %v3536_v22 = vpop.eup %3535  ;;  %3553 = vpow2.f32 %v1153_v31  ;;  %v1207_v42 = vpop.permute.xlu1 %1206  ;;  %v1972_v9 = vpack.c.bf16 %v3534_v45, %v3526_v18  ;;  %v1159_v41 = vmul.f32 1.442695, %v1100_v12  ;;  %v1161_v12 = vmul.f32 1.442695, %v1101_v43  ;;  %v5424_v43 = vld [vmem:[#allocation19_spill] sm:$0xff] }
 0x265   : > { %v4721_v13 = vpop.eup %3537  ;;  %3555 = vpow2.f32 %v1417_v46  ;;  %v1343_v40 = vsub.f32 %v5415_v39, %v1207_v42  ;;  %v1344_v27 = vsub.f32 %v5416_v49, %v1207_v42  ;;  %1860 = vperm.xlu1 %3432, %v4692_v35   ;;  %v1973_v3 = vpack.c.bf16 %v3536_v22, %v3528_v60 }
 0x266   : > { %v4726_v38 = vpop.eup %3539  ;;  %3557 = vpow2.f32 %v1419_v0  ;;  %v4728_v59 = vadd.f32 %v3536_v22, %v3534_v45  ;;  %v1102_v45 = vsub.f32 %v4536_v47, %v4547_v57  ;;  %v5419_v0 = vld [vmem:[#allocation16_spill] sm:$0xff]  ;;  %v1103_v42 = vsub.f32 %v4559_v55, %v4567_v30 }
 0x267   : > { %v3542_v7 = vpop.eup %3541  ;;  %3559 = vpow2.f32 %v1155_v24  ;;  %v1421_v8 = vmul.f32 1.442695, %v1343_v40  ;;  %v1423_v31 = vmul.f32 1.442695, %v1344_v27  ;;  %2138 = vmatprep.mubr.bf16.mxu1 %v1973_v3  ;;  %1865 = vperm.xlu0 %3431, %v4697_v14  }
 0x268   : > { %v3544_v18 = vpop.eup %3543  ;;  %3561 = vpow2.f32 %v1157_v19  ;;  %2139 = vmatmul.mubr.bf16.gmra.mrb[4].mxu1 %v1972_v9  ;;  %v1212_v60 = vpop.permute.xlu1 %1211  ;;  %v5420_v19 = vld [vmem:[#allocation17_spill] sm:$0xff]  ;;  %v1163_v27 = vmul.f32 1.442695, %v1102_v45  ;;  %v1165_v30 = vmul.f32 1.442695, %v1103_v42 }
 0x269   : > { %3563 = vpow2.f32 %v1421_v8  ;;  %v1345_v56 = vsub.f32 %v5417_v21, %v1212_v60  ;;  %v1346_v34 = vsub.f32 %v5418_v33, %v1212_v60  ;;  %1870 = vperm.xlu1 %3432, %v4709_v10   ;;  %v4736_v1 = vadd.f32 %v3544_v18, %v3542_v7  ;;  %v4738_v2 = vpop.eup %3545 }
 0x26a   : > { %3565 = vpow2.f32 %v1423_v31  ;;  %v1217_v24 = vpop.permute.xlu0 %1216 }
 0x26b   : > { %v3548_v46 = vpop.eup %3547  ;;  %v1425_v53 = vmul.f32 1.442695, %v1345_v56  ;;  %v1427_v63 = vmul.f32 1.442695, %v1346_v34  ;;  %v1347_v22 = vsub.f32 %v5419_v0, %v1217_v24  ;;  %v1348_v20 = vsub.f32 %v5420_v19, %v1217_v24  ;;  %1875 = vperm.xlu0 %3431, %v4716_v6  }
 0x26c   : > { %v3550_v37 = vpop.eup %3549  ;;  %3567 = vpow2.f32 %v1159_v41  ;;  %v1974_v9 = vpack.c.bf16 %v3548_v46, %v3542_v7 }
 0x26d   : > { %v4747_v39 = vpop.eup %3551  ;;  %3569 = vpow2.f32 %v1425_v53  ;;  %v1429_v47 = vmul.f32 1.442695, %v1347_v22  ;;  %v1431_v57 = vmul.f32 1.442695, %v1348_v20  ;;  %1880 = vperm.xlu1 %3432, %v4721_v13   ;;  %v1975_v40 = vpack.c.bf16 %v3550_v37, %v3544_v18  ;;  %v5423_v18 = vld [vmem:[#allocation18_spill] sm:$0xff] }
 0x26e   : > { %5421 = vst [vmem:[#allocation62_spill] sm:$0xff] %v4747_v39  ;;  %v4750_v49 = vpop.eup %3553  ;;  %3571 = vpow2.f32 %v1427_v63  ;;  %v4752_v3 = vadd.f32 %v3550_v37, %v3548_v46  ;;  %v5426_v46 = vld [vmem:[#allocation20_spill] sm:$0xff]  ;;  %v5427_v63 = vld [vmem:[#allocation21_spill] sm:$0xff] }
 0x26f   : > { %v3556_v8 = vpop.eup %3555  ;;  %3573 = vpow2.f32 %v1429_v47  ;;  %2146 = vmatprep.mubr.bf16.mxu1 %v1975_v40  ;;  %1885 = vperm.xlu0 %3431, %v4726_v38  }
 0x270   : > { %v3558_v55 = vpop.eup %3557  ;;  %3575 = vpow2.f32 %v1431_v57  ;;  %2147 = vmatmul.mubr.bf16.gmra.mrb[8].mxu1 %v1974_v9  ;;  %v1222_v7 = vpop.permute.xlu1 %1221 }
 0x271   : > { %v4755_v31 = vpop.eup %3559  ;;  %3577 = vpow2.f32 %v1161_v12  ;;  %v1349_v41 = vsub.f32 %v5423_v18, %v1222_v7  ;;  %v1350_v60 = vsub.f32 %v5424_v43, %v1222_v7  ;;  %1890 = vperm.xlu1 %3432, %v4738_v2   ;;  %v4760_v21 = vadd.f32 %v3558_v55, %v3556_v8  ;;  %v5430_v7 = vld [vmem:[#allocation23_spill] sm:$0xff] }
 0x272   : > { %5422 = vst [vmem:[#allocation64_spill] sm:$0xff] %v4755_v31  ;;  %v4762_v56 = vpop.eup %3561  ;;  %3579 = vpow2.f32 %v1163_v27  ;;  %v1227_v33 = vpop.permute.xlu0 %1226 }
 0x273   : > { %5425 = vst [vmem:[#allocation68_spill] sm:$0xff] %v4762_v56  ;;  %v3564_v34 = vpop.eup %3563  ;;  %v1433_v45 = vmul.f32 1.442695, %v1349_v41  ;;  %v1435_v24 = vmul.f32 1.442695, %v1350_v60  ;;  %v1351_v53 = vsub.f32 %v5426_v46, %v1227_v33  ;;  %v1352_v0 = vsub.f32 %v5427_v63, %v1227_v33  ;;  %1895 = vperm.xlu0 %3431, %v4747_v39  }
 0x274   : > { %v3566_v22 = vpop.eup %3565  ;;  %3581 = vpow2.f32 %v1165_v30  ;;  %v1976_v19 = vpack.c.bf16 %v3564_v34, %v3556_v8  ;;  %v5429_v8 = vld [vmem:[#allocation22_spill] sm:$0xff] }
 0x275   : > { %3583 = vpow2.f32 %v1433_v45  ;;  %v1437_v20 = vmul.f32 1.442695, %v1351_v53  ;;  %v1439_v37 = vmul.f32 1.442695, %v1352_v0  ;;  %1900 = vperm.xlu1 %3432, %v4750_v49   ;;  %v1977_v12 = vpack.c.bf16 %v3566_v22, %v3558_v55  ;;  %v5433_v53 = vld [vmem:[#allocation25_spill] sm:$0xff] }
 0x276   : > { %v4768_v42 = vpop.eup %3567  ;;  %3585 = vpow2.f32 %v1435_v24  ;;  %v4770_v9 = vadd.f32 %v3566_v22, %v3564_v34  ;;  %v5432_v24 = vld [vmem:[#allocation24_spill] sm:$0xff] }
 0x277   : > { %5428 = vst [vmem:[#allocation66_spill] sm:$0xff] %v4768_v42  ;;  %v3570_v47 = vpop.eup %3569  ;;  %3587 = vpow2.f32 %v1437_v20  ;;  %2154 = vmatprep.mubr.bf16.mxu1 %v1977_v12  ;;  %1905 = vperm.xlu0 %3431, %v4755_v31  }
 0x278   : > { %v3572_v57 = vpop.eup %3571  ;;  %3589 = vpow2.f32 %v1439_v37  ;;  %2155 = vmatmul.mubr.bf16.gmra.mrb[12].mxu1 %v1976_v19  ;;  %v1232_v40 = vpop.permute.xlu1 %1231 }
 0x279   : > { %v3574_v27 = vpop.eup %3573  ;;  %v1353_v30 = vsub.f32 %v5429_v8, %v1232_v40  ;;  %v1354_v18 = vsub.f32 %v5430_v7, %v1232_v40  ;;  %1910 = vperm.xlu1 %3432, %v4762_v56   ;;  %v4776_v55 = vadd.f32 %v3572_v57, %v3570_v47  ;;  %v5437_v7 = vld [vmem:[#allocation27_spill] sm:$0xff] }
 0x27a   : > { %v3576_v41 = vpop.eup %3575  ;;  %v1237_v43 = vpop.permute.xlu0 %1236  ;;  %v1978_v60 = vpack.c.bf16 %v3574_v27, %v3570_v47 }
 0x27b   : > { %v4778_v33 = vpop.eup %3577  ;;  %v1441_v34 = vmul.f32 1.442695, %v1353_v30  ;;  %v1443_v45 = vmul.f32 1.442695, %v1354_v18  ;;  %v1355_v46 = vsub.f32 %v5432_v24, %v1237_v43  ;;  %v1356_v63 = vsub.f32 %v5433_v53, %v1237_v43  ;;  %1915 = vperm.xlu0 %3431, %v4768_v42   ;;  %v5438_v53 = vld [vmem:[#allocation28_spill] sm:$0xff] }
 0x27c   : > { %5431 = vst [vmem:[#allocation8_spill] sm:$0xff] %v4778_v33  ;;  %v4783_v0 = vpop.eup %3579  ;;  %v1979_v22 = vpack.c.bf16 %v3576_v41, %v3572_v57  ;;  %v4785_v19 = vadd.f32 %v3576_v41, %v3574_v27  ;;  %v5436_v27 = vld [vmem:[#allocation26_spill] sm:$0xff] }
 0x27d   : > { %5434 = vst [vmem:[#allocation9_spill] sm:$0xff] %v4783_v0  ;;  %3591 = vpow2.f32 %v1441_v34  ;;  %v1445_v20 = vmul.f32 1.442695, %v1355_v46  ;;  %v1447_v37 = vmul.f32 1.442695, %v1356_v63  ;;  %1920 = vperm.xlu1 %3432, %v4778_v33  }
 0x27e   : > { %v4788_v12 = vpop.eup %3581  ;;  %3593 = vpow2.f32 %v1443_v45  ;;  %2162 = vmatprep.mubr.bf16.mxu1 %v1979_v22  ;;  %v5439_v22 = vld [vmem:[#allocation29_spill] sm:$0xff] }
 0x27f   : > { %5435 = vst [vmem:[#allocation63_spill] sm:$0xff] %v4788_v12  ;;  %v3584_v47 = vpop.eup %3583  ;;  %3595 = vpow2.f32 %v1445_v20  ;;  %1925 = vperm.xlu0 %3431, %v4783_v0  }
 0x280   : > { %v3586_v40 = vpop.eup %3585  ;;  %3597 = vpow2.f32 %v1447_v37  ;;  %2163 = vmatmul.mubr.bf16.gmra.mrb[16].mxu1 %v1978_v60  ;;  %v1242_v8 = vpop.permute.xlu1 %1241 }
 0x281   : > { %v3588_v57 = vpop.eup %3587  ;;  %v1357_v30 = vsub.f32 %v5436_v27, %v1242_v8  ;;  %v1358_v18 = vsub.f32 %v5437_v7, %v1242_v8  ;;  %1930 = vperm.xlu1 %3432, %v4788_v12   ;;  %v4794_v41 = vadd.f32 %v3586_v40, %v3584_v47 }
 0x282   : > { %v3590_v43 = vpop.eup %3589  ;;  %v1247_v34 = vpop.permute.xlu0 %1246  ;;  %v1980_v45 = vpack.c.bf16 %v3588_v57, %v3584_v47 }
 0x283   : > { %v1449_v24 = vmul.f32 1.442695, %v1357_v30  ;;  %v1451_v46 = vmul.f32 1.442695, %v1358_v18  ;;  %v1359_v63 = vsub.f32 %v5438_v53, %v1247_v34  ;;  %v1360_v20 = vsub.f32 %v5439_v22, %v1247_v34  ;;  %v5440_v18 = vld [vmem:[#allocation30_spill] sm:$0xff]  ;;  %v5441_v53 = vld [vmem:[#allocation31_spill] sm:$0xff] }
 0x284   : > { %v1981_v60 = vpack.c.bf16 %v3590_v43, %v3586_v40  ;;  %v4798_v37 = vadd.f32 %v3590_v43, %v3588_v57 }
 0x285   : > { %3599 = vpow2.f32 %v1449_v24  ;;  %v1453_v27 = vmul.f32 1.442695, %v1359_v63  ;;  %v1455_v48 = vmul.f32 1.442695, %v1360_v20  ;;  %v5443_v20 = vld [vmem:[#allocation33_spill] sm:$0xff] }
 0x286   : > { %3601 = vpow2.f32 %v1451_v46  ;;  %2170 = vmatprep.mubr.bf16.mxu1 %v1981_v60  ;;  %v5442_v46 = vld [vmem:[#allocation32_spill] sm:$0xff] }
 0x287   : > { %v3592_v8 = vpop.eup %3591  ;;  %3603 = vpow2.f32 %v1453_v27 }
 0x288   : > { %v3594_v7 = vpop.eup %3593  ;;  %3605 = vpow2.f32 %v1455_v48  ;;  %2171 = vmatmul.mubr.bf16.gmra.mrb[20].mxu1 %v1980_v45  ;;  %v1252_v47 = vpop.permute.xlu1 %1251 }
 0x289   : > { %v3596_v30 = vpop.eup %3595  ;;  %v1361_v0 = vsub.f32 %v5440_v18, %v1252_v47  ;;  %v1362_v12 = vsub.f32 %v5441_v53, %v1252_v47  ;;  %v4802_v34 = vadd.f32 %v3594_v7, %v3592_v8 }
 0x28a   : > { %v3598_v40 = vpop.eup %3597  ;;  %v1257_v57 = vpop.permute.xlu0 %1256  ;;  %v1982_v43 = vpack.c.bf16 %v3596_v30, %v3592_v8 }
 0x28b   : > { %v1457_v24 = vmul.f32 1.442695, %v1361_v0  ;;  %v1459_v63 = vmul.f32 1.442695, %v1362_v12  ;;  %v1363_v22 = vsub.f32 %v5442_v46, %v1257_v57  ;;  %v1364_v60 = vsub.f32 %v5443_v20, %v1257_v57  ;;  %v5444_v12 = vld [vmem:[#allocation34_spill] sm:$0xff]  ;;  %v5445_v46 = vld [vmem:[#allocation35_spill] sm:$0xff] }
 0x28c   : > { %v1983_v27 = vpack.c.bf16 %v3598_v40, %v3594_v7  ;;  %v4806_v48 = vadd.f32 %v3598_v40, %v3596_v30 }
 0x28d   : > { %3607 = vpow2.f32 %v1457_v24  ;;  %v1461_v45 = vmul.f32 1.442695, %v1363_v22  ;;  %v1463_v42 = vmul.f32 1.442695, %v1364_v60  ;;  %v5447_v60 = vld [vmem:[#allocation37_spill] sm:$0xff] }
 0x28e   : > { %3609 = vpow2.f32 %v1459_v63  ;;  %2178 = vmatprep.mubr.bf16.mxu1 %v1983_v27  ;;  %v5446_v63 = vld [vmem:[#allocation36_spill] sm:$0xff] }
 0x28f   : > { %v3600_v47 = vpop.eup %3599  ;;  %3611 = vpow2.f32 %v1461_v45 }
 0x290   : > { %v3602_v18 = vpop.eup %3601  ;;  %3613 = vpow2.f32 %v1463_v42  ;;  %2179 = vmatmul.mubr.bf16.gmra.mrb[24].mxu1 %v1982_v43  ;;  %v1262_v8 = vpop.permute.xlu1 %1261 }
 0x291   : > { %v3604_v0 = vpop.eup %3603  ;;  %v1365_v53 = vsub.f32 %v5444_v12, %v1262_v8  ;;  %v1366_v33 = vsub.f32 %v5445_v46, %v1262_v8  ;;  %v4810_v57 = vadd.f32 %v3602_v18, %v3600_v47 }
 0x292   : > { %v3606_v7 = vpop.eup %3605  ;;  %v1267_v30 = vpop.permute.xlu0 %1266  ;;  %v1984_v40 = vpack.c.bf16 %v3604_v0, %v3600_v47 }
 0x293   : > { %v1465_v24 = vmul.f32 1.442695, %v1365_v53  ;;  %v1467_v22 = vmul.f32 1.442695, %v1366_v33  ;;  %v1367_v20 = vsub.f32 %v5446_v63, %v1267_v30  ;;  %v1368_v27 = vsub.f32 %v5447_v60, %v1267_v30  ;;  %v5448_v33 = vld [vmem:[#allocation38_spill] sm:$0xff]  ;;  %v5449_v63 = vld [vmem:[#allocation39_spill] sm:$0xff] }
 0x294   : > { %v1985_v45 = vpack.c.bf16 %v3606_v7, %v3602_v18  ;;  %v4814_v42 = vadd.f32 %v3606_v7, %v3604_v0 }
 0x295   : > { %3615 = vpow2.f32 %v1465_v24  ;;  %v1469_v43 = vmul.f32 1.442695, %v1367_v20  ;;  %v1471_v31 = vmul.f32 1.442695, %v1368_v27  ;;  %v5451_v27 = vld [vmem:[#allocation41_spill] sm:$0xff] }
 0x296   : > { %3617 = vpow2.f32 %v1467_v22  ;;  %2186 = vmatprep.mubr.bf16.mxu1 %v1985_v45  ;;  %v5450_v22 = vld [vmem:[#allocation40_spill] sm:$0xff] }
 0x297   : > { %v3608_v8 = vpop.eup %3607  ;;  %3619 = vpow2.f32 %v1469_v43 }
 0x298   : > { %v3610_v12 = vpop.eup %3609  ;;  %3621 = vpow2.f32 %v1471_v31  ;;  %2187 = vmatmul.mubr.bf16.gmra.mrb[28].mxu1 %v1984_v40  ;;  %v1272_v47 = vpop.permute.xlu1 %1271 }
 0x299   : > { %v3612_v53 = vpop.eup %3611  ;;  %v1369_v46 = vsub.f32 %v5448_v33, %v1272_v47  ;;  %v1370_v56 = vsub.f32 %v5449_v63, %v1272_v47  ;;  %v4818_v30 = vadd.f32 %v3610_v12, %v3608_v8 }
 0x29a   : > { %v3614_v18 = vpop.eup %3613  ;;  %v1277_v0 = vpop.permute.xlu0 %1276  ;;  %v1986_v7 = vpack.c.bf16 %v3612_v53, %v3608_v8 }
 0x29b   : > { %v1473_v24 = vmul.f32 1.442695, %v1369_v46  ;;  %v1475_v20 = vmul.f32 1.442695, %v1370_v56  ;;  %v1371_v60 = vsub.f32 %v5450_v22, %v1277_v0  ;;  %v1372_v45 = vsub.f32 %v5451_v27, %v1277_v0  ;;  %v5452_v46 = vld [vmem:[#allocation42_spill] sm:$0xff]  ;;  %v5453_v0 = vld [vmem:[#allocation43_spill] sm:$0xff] }
 0x29c   : > { %v1987_v43 = vpack.c.bf16 %v3614_v18, %v3610_v12  ;;  %v4822_v31 = vadd.f32 %v3614_v18, %v3612_v53 }
 0x29d   : > { %3623 = vpow2.f32 %v1473_v24  ;;  %v1477_v40 = vmul.f32 1.442695, %v1371_v60  ;;  %v1479_v39 = vmul.f32 1.442695, %v1372_v45  ;;  %v5454_v60 = vld [vmem:[#allocation44_spill] sm:$0xff]  ;;  %v5455_v45 = vld [vmem:[#allocation45_spill] sm:$0xff] }
 0x29e   : > { %3625 = vpow2.f32 %v1475_v20  ;;  %2194 = vmatprep.mubr.bf16.mxu1 %v1987_v43  ;;  %1589 = vadd.xlane.f32.xlu0 %v4699_v44 }
 0x29f   : > { %v3616_v47 = vpop.eup %3615  ;;  %3627 = vpow2.f32 %v1477_v40 }
 0x2a0   : > { %v3618_v33 = vpop.eup %3617  ;;  %3629 = vpow2.f32 %v1479_v39  ;;  %2195 = vmatmul.mubr.bf16.gmra.mrb[32].mxu1 %v1986_v7  ;;  %v1282_v56 = vpop.permute.xlu1 %1281 }
 0x2a1   : > { %v3620_v8 = vpop.eup %3619  ;;  %v1373_v63 = vsub.f32 %v5452_v46, %v1282_v56  ;;  %v1374_v12 = vsub.f32 %v5453_v0, %v1282_v56  ;;  %v4827_v53 = vadd.f32 %v3618_v33, %v3616_v47  ;;  %v5456_v0 = vld [vmem:[#allocation46_spill] sm:$0xff] }
 0x2a2   : > { %v3622_v18 = vpop.eup %3621  ;;  %v1287_v24 = vpop.permute.xlu0 %1286  ;;  %1592 = vadd.xlane.f32.xlu0 %v4714_v26  ;;  %v1988_v20 = vpack.c.bf16 %v3620_v8, %v3616_v47 }
 0x2a3   : > { %v1481_v22 = vmul.f32 1.442695, %v1373_v63  ;;  %v1483_v44 = vmul.f32 1.442695, %v1374_v12  ;;  %v1375_v27 = vsub.f32 %v5454_v60, %v1287_v24  ;;  %v1376_v39 = vsub.f32 %v5455_v45, %v1287_v24  ;;  %v5458_v60 = vld [vmem:[#allocation48_spill] sm:$0xff] }
 0x2a4   : > { %v1989_v7 = vpack.c.bf16 %v3622_v18, %v3618_v33  ;;  %v4832_v43 = vadd.f32 %v3622_v18, %v3620_v8  ;;  %v5457_v8 = vld [vmem:[#allocation47_spill] sm:$0xff] }
 0x2a5   : > { %3631 = vpow2.f32 %v1481_v22  ;;  %v1485_v40 = vmul.f32 1.442695, %v1375_v27  ;;  %v1487_v46 = vmul.f32 1.442695, %v1376_v39  ;;  %1586 = vadd.xlane.f32.xlu1 %v4682_v61 }
 0x2a6   : > { %3633 = vpow2.f32 %v1483_v44  ;;  %2202 = vmatprep.mubr.bf16.mxu1 %v1989_v7  ;;  %1598 = vadd.xlane.f32.xlu0 %v4736_v1 }
 0x2a7   : > { %v3624_v26 = vpop.eup %3623  ;;  %3635 = vpow2.f32 %v1485_v40 }
 0x2a8   : > { %v3626_v47 = vpop.eup %3625  ;;  %3637 = vpow2.f32 %v1487_v46  ;;  %2203 = vmatmul.mubr.bf16.gmra.mrb[36].mxu1 %v1988_v20  ;;  %v1292_v56 = vpop.permute.xlu1 %1291  ;;  %v5459_v20 = vld [vmem:[#allocation49_spill] sm:$0xff] }
 0x2a9   : > { %v3628_v63 = vpop.eup %3627  ;;  %v1377_v33 = vsub.f32 %v5456_v0, %v1292_v56  ;;  %v1378_v12 = vsub.f32 %v5457_v8, %v1292_v56  ;;  %1595 = vadd.xlane.f32.xlu1 %v4728_v59  ;;  %v4839_v18 = vadd.f32 %v3626_v47, %v3624_v26  ;;  %v5460_v0 = vld [vmem:[#allocation50_spill] sm:$0xff] }
 0x2aa   : > { %v3630_v61 = vpop.eup %3629  ;;  %v1297_v24 = vpop.permute.xlu0 %1296  ;;  %1604 = vadd.xlane.f32.xlu0 %v4760_v21  ;;  %v1990_v1 = vpack.c.bf16 %v3628_v63, %v3624_v26 }
 0x2ab   : > { %v1489_v22 = vmul.f32 1.442695, %v1377_v33  ;;  %v1491_v44 = vmul.f32 1.442695, %v1378_v12  ;;  %v1379_v27 = vsub.f32 %v5458_v60, %v1297_v24  ;;  %v1380_v45 = vsub.f32 %v5459_v20, %v1297_v24 }
 0x2ac   : > { %v1991_v39 = vpack.c.bf16 %v3630_v61, %v3626_v47  ;;  %v4844_v7 = vadd.f32 %v3630_v61, %v3628_v63  ;;  %v5461_v63 = vld [vmem:[#allocation51_spill] sm:$0xff] }
 0x2ad   : > { %3639 = vpow2.f32 %v1489_v22  ;;  %v1493_v40 = vmul.f32 1.442695, %v1379_v27  ;;  %v1495_v46 = vmul.f32 1.442695, %v1380_v45  ;;  %1601 = vadd.xlane.f32.xlu1 %v4752_v3  ;;  %v5462_v22 = vld [vmem:[#allocation52_spill] sm:$0xff] }
 0x2ae   : > { %3641 = vpow2.f32 %v1491_v44  ;;  %2210 = vmatprep.mubr.bf16.mxu1 %v1991_v39  ;;  %1610 = vadd.xlane.f32.xlu0 %v4776_v55 }
 0x2af   : > { %v3632_v59 = vpop.eup %3631  ;;  %3643 = vpow2.f32 %v1493_v40 }
 0x2b0   : > { %v3634_v21 = vpop.eup %3633  ;;  %3645 = vpow2.f32 %v1495_v46  ;;  %2211 = vmatmul.mubr.bf16.gmra.mrb[40].mxu1 %v1990_v1  ;;  %v1302_v26 = vpop.permute.xlu1 %1301  ;;  %v5463_v1 = vld [vmem:[#allocation53_spill] sm:$0xff] }
 0x2b1   : > { %v3636_v56 = vpop.eup %3635  ;;  %v1381_v47 = vsub.f32 %v5460_v0, %v1302_v26  ;;  %v1382_v33 = vsub.f32 %v5461_v63, %v1302_v26  ;;  %1607 = vadd.xlane.f32.xlu1 %v4770_v9  ;;  %v4851_v8 = vadd.f32 %v3634_v21, %v3632_v59  ;;  %v5465_v26 = vld [vmem:[#allocation55_spill] sm:$0xff] }
 0x2b2   : > { %v3638_v3 = vpop.eup %3637  ;;  %v1307_v12 = vpop.permute.xlu0 %1306  ;;  %1616 = vadd.xlane.f32.xlu0 %v4794_v41  ;;  %v1992_v55 = vpack.c.bf16 %v3636_v56, %v3632_v59  ;;  %v5464_v59 = vld [vmem:[#allocation54_spill] sm:$0xff] }
 0x2b3   : > { %v1497_v61 = vmul.f32 1.442695, %v1381_v47  ;;  %v1499_v24 = vmul.f32 1.442695, %v1382_v33  ;;  %v1383_v44 = vsub.f32 %v5462_v22, %v1307_v12  ;;  %v1384_v60 = vsub.f32 %v5463_v1, %v1307_v12 }
 0x2b4   : > { %v1993_v27 = vpack.c.bf16 %v3638_v3, %v3634_v21  ;;  %v4856_v20 = vadd.f32 %v3638_v3, %v3636_v56  ;;  %v5466_v3 = vld [vmem:[#allocation56_spill] sm:$0xff] }
 0x2b5   : > { %3647 = vpow2.f32 %v1497_v61  ;;  %v1501_v45 = vmul.f32 1.442695, %v1383_v44  ;;  %v1503_v39 = vmul.f32 1.442695, %v1384_v60  ;;  %1613 = vadd.xlane.f32.xlu1 %v4785_v19  ;;  %v5467_v61 = vld [vmem:[#allocation57_spill] sm:$0xff] }
 0x2b6   : > { %3649 = vpow2.f32 %v1499_v24  ;;  %2218 = vmatprep.mubr.bf16.mxu1 %v1993_v27  ;;  %1622 = vadd.xlane.f32.xlu0 %v4802_v34 }
 0x2b7   : > { %v3640_v9 = vpop.eup %3639  ;;  %3651 = vpow2.f32 %v1501_v45  ;;  %v5468_v45 = vld [vmem:[#allocation58_spill] sm:$0xff] }
 0x2b8   : > { %v3642_v41 = vpop.eup %3641  ;;  %3653 = vpow2.f32 %v1503_v39  ;;  %2219 = vmatmul.mubr.bf16.gmra.mrb[44].mxu1 %v1992_v55  ;;  %v1312_v40 = vpop.permute.xlu1 %1311 }
 0x2b9   : > { %v3644_v46 = vpop.eup %3643  ;;  %v1385_v21 = vsub.f32 %v5464_v59, %v1312_v40  ;;  %v1386_v56 = vsub.f32 %v5465_v26, %v1312_v40  ;;  %1619 = vadd.xlane.f32.xlu1 %v4798_v37  ;;  %v1657_v0 = vadd.f32 %v3642_v41, %v3640_v9  ;;  %v5470_v26 = vld [vmem:[#allocation60_spill] sm:$0xff] }
 0x2ba   : > { %v3646_v47 = vpop.eup %3645  ;;  %v1317_v19 = vpop.permute.xlu0 %1316  ;;  %1628 = vadd.xlane.f32.xlu0 %v4810_v57  ;;  %v1994_v63 = vpack.c.bf16 %v3644_v46, %v3640_v9  ;;  %v5469_v9 = vld [vmem:[#allocation59_spill] sm:$0xff] }
 0x2bb   : > { %v1505_v34 = vmul.f32 1.442695, %v1385_v21  ;;  %v1507_v33 = vmul.f32 1.442695, %v1386_v56  ;;  %v1387_v12 = vsub.f32 %v5466_v3, %v1317_v19  ;;  %v1388_v55 = vsub.f32 %v5467_v61, %v1317_v19 }
 0x2bc   : > { %v1995_v24 = vpack.c.bf16 %v3646_v47, %v3642_v41  ;;  %v4866_v22 = vadd.f32 %v3646_v47, %v3644_v46  ;;  %v5471_v47 = vld [vmem:[#allocation61_spill] sm:$0xff] }
 0x2bd   : > { %3655 = vpow2.f32 %v1505_v34  ;;  %v1509_v44 = vmul.f32 1.442695, %v1387_v12  ;;  %v1511_v1 = vmul.f32 1.442695, %v1388_v55  ;;  %1625 = vadd.xlane.f32.xlu1 %v4806_v48 }
 0x2be   : > { %3657 = vpow2.f32 %v1507_v33  ;;  %2226 = vmatprep.mubr.bf16.mxu1 %v1995_v24  ;;  %1634 = vadd.xlane.f32.xlu0 %v4818_v30 }
 0x2bf   : > { %v3648_v37 = vpop.eup %3647  ;;  %3659 = vpow2.f32 %v1509_v44 }
 0x2c0   : > { %v3650_v57 = vpop.eup %3649  ;;  %3661 = vpow2.f32 %v1511_v1  ;;  %2227 = vmatmul.mubr.bf16.gmra.mrb[48].mxu1 %v1994_v63  ;;  %v1322_v60 = vpop.permute.xlu1 %1321 }
 0x2c1   : > { %v3652_v27 = vpop.eup %3651  ;;  %v1389_v39 = vsub.f32 %v5468_v45, %v1322_v60  ;;  %v1390_v41 = vsub.f32 %v5469_v9, %v1322_v60  ;;  %1631 = vadd.xlane.f32.xlu1 %v4814_v42  ;;  %v1663_v40 = vadd.f32 %v3650_v57, %v3648_v37 }
 0x2c2   : > { %v3654_v46 = vpop.eup %3653  ;;  %v1327_v48 = vpop.permute.xlu0 %1326  ;;  %1640 = vadd.xlane.f32.xlu0 %v4827_v53  ;;  %v1996_v59 = vpack.c.bf16 %v3652_v27, %v3648_v37 }
 0x2c3   : > { %v1513_v30 = vmul.f32 1.442695, %v1389_v39  ;;  %v1515_v21 = vmul.f32 1.442695, %v1390_v41  ;;  %v1391_v56 = vsub.f32 %v5470_v26, %v1327_v48  ;;  %v1392_v19 = vsub.f32 %v5471_v47, %v1327_v48 }
 0x2c4   : > { %v1997_v63 = vpack.c.bf16 %v3654_v46, %v3650_v57  ;;  %v1666_v34 = vadd.f32 %v3654_v46, %v3652_v27  ;;  %v4884_v39 = vpop.permute.xlu1 %1785  ;;  %v5472_v41 = vsub.f32 %v4564_v28, %v4578_v62 }
 0x2c5   : > { %3663 = vpow2.f32 %v1513_v30  ;;  %v1517_v33 = vmul.f32 1.442695, %v1391_v56  ;;  %v1519_v3 = vmul.f32 1.442695, %v1392_v19  ;;  %1637 = vadd.xlane.f32.xlu1 %v4822_v31 }
 0x2c6   : > { %3665 = vpow2.f32 %v1515_v21  ;;  %2234 = vmatprep.mubr.bf16.mxu1 %v1997_v63  ;;  %1646 = vadd.xlane.f32.xlu0 %v4839_v18  ;;  %v4882_v27 = vpop.permute.xlu0 %1780 }
 0x2c7   : > { %v3656_v42 = vpop.eup %3655  ;;  %3667 = vpow2.f32 %v1517_v33 }
 0x2c8   : > { %v3658_v53 = vpop.eup %3657  ;;  %3669 = vpow2.f32 %v1519_v3  ;;  %2235 = vmatmul.mubr.bf16.gmra.mrb[52].mxu1 %v1996_v59 }
 0x2c9   : > { %v3660_v12 = vpop.eup %3659  ;;  %1643 = vadd.xlane.f32.xlu1 %v4832_v43  ;;  %v1669_v61 = vadd.f32 %v3658_v53, %v3656_v42 }
 0x2ca   : > { %v3662_v55 = vpop.eup %3661  ;;  %1652 = vadd.xlane.f32.xlu0 %v4851_v8  ;;  %v1998_v24 = vpack.c.bf16 %v3660_v12, %v3656_v42 }
 0x2cb   : > { %v1999_v44 = vpack.c.bf16 %v3662_v55, %v3658_v53  ;;  %v1672_v1 = vadd.f32 %v3662_v55, %v3660_v12 }
 0x2cd   : > { %2242 = vmatprep.mubr.bf16.mxu1 %v1999_v44  ;;  %1649 = vadd.xlane.f32.xlu1 %v4844_v7  ;;  %v4887_v7 = vpop.permute.xlu0 %1795 }
 0x2ce   : > { %1658 = vadd.xlane.f32.xlu0 %v1657_v0  ;;  %v4889_v0 = vpop.permute.xlu1 %1790 }
 0x2cf   : > { %v3664_v31 = vpop.eup %3663 }
 0x2d0   : > { %v3666_v18 = vpop.eup %3665  ;;  %2243 = vmatmul.mubr.bf16.gmra.mrb[56].mxu1 %v1998_v24 }
 0x2d1   : > { %v3668_v37 = vpop.eup %3667  ;;  %1655 = vadd.xlane.f32.xlu1 %v4856_v20  ;;  %v1675_v57 = vadd.f32 %v3666_v18, %v3664_v31  ;;  %v4891_v20 = vpop.permute.xlu0 %1805 }
 0x2d2   : > { %v3670_v60 = vpop.eup %3669  ;;  %1664 = vadd.xlane.f32.xlu0 %v1663_v40  ;;  %v2000_v43 = vpack.c.bf16 %v3668_v37, %v3664_v31  ;;  %v4893_v9 = vpop.permute.xlu1 %1800  ;;  %v1167_v40 = vmul.f32 1.442695, %v5472_v41  ;;  %v1522_v31 = vld [vmem:[#allocation3 + $0x8] sm:$0xff]  ;;  %v1521_v41 = vld [vmem:[#allocation3] sm:$0xff] }
 0x2d3   : > { %v2001_v8 = vpack.c.bf16 %v3670_v60, %v3666_v18  ;;  %v1678_v45 = vadd.f32 %v3670_v60, %v3668_v37  ;;  %v1554_v37 = vmul.f32 %v4592_v50, %v1522_v31  ;;  %v1523_v60 = vld [vmem:[#allocation3 + $0x10] sm:$0xff]  ;;  %v1524_v31 = vld [vmem:[#allocation3 + $0x18] sm:$0xff] }
 0x2d4   : > { %3671 = vpow2.f32 %v1167_v40 }
 0x2d5   : > { %2250 = vmatprep.mubr.bf16.mxu1 %v2001_v8  ;;  %1661 = vadd.xlane.f32.xlu1 %v4866_v22  ;;  %v4898_v22 = vpop.permute.xlu0 %1815 }
 0x2d6   : > { %1670 = vadd.xlane.f32.xlu0 %v1669_v61  ;;  %v4900_v46 = vpop.permute.xlu1 %1810 }
 0x2d8   : > { %2251 = vmatmul.mubr.bf16.gmra.mrb[60].mxu1 %v2000_v43 }
 0x2d9   : > { %1667 = vadd.xlane.f32.xlu1 %v1666_v34  ;;  %v4902_v48 = vpop.permute.xlu0 %1825 }
 0x2da   : > { %1676 = vadd.xlane.f32.xlu0 %v1675_v57  ;;  %v4904_v59 = vpop.permute.xlu1 %1820 }
 0x2dd   : > { %1673 = vadd.xlane.f32.xlu1 %v1672_v1  ;;  %v4909_v21 = vpop.permute.xlu0 %1835 }
 0x2de   : > { %v4906_v30 = vpop.eup %3671  ;;  %v4911_v26 = vpop.permute.xlu1 %1830 }
 0x2e1   : > { %1679 = vadd.xlane.f32.xlu1 %v1678_v45  ;;  %v4913_v28 = vpop.permute.xlu0 %1845  ;;  %v1555_v45 = vmul.f32 %v4610_v4, %v1523_v60  ;;  %v1938_v4 = vmul.f32 0.0, %v4882_v27 }
 0x2e2   : > { %v4915_v62 = vpop.permute.xlu1 %1840 }
 0x2e5   : > { %v4917_v56 = vpop.permute.xlu0 %1855 }
 0x2e6   : > { %v4919_v47 = vpop.permute.xlu1 %1850 }
 0x2e9   : > { %v4921_v19 = vpop.permute.xlu0 %1865 }
 0x2ea   : > { %v4923_v63 = vpop.permute.xlu1 %1860 }
 0x2ed   : > { %v4925_v34 = vpop.permute.xlu0 %1875 }
 0x2ee   : > { %v4927_v33 = vpop.permute.xlu1 %1870 }
 0x2f0   : > { %1935 = vperm.xlu0 %3431, %v4906_v30  }
 0x2f1   : > { %v4929_v3 = vpop.permute.xlu0 %1885 }
 0x2f2   : > { %v4931_v42 = vpop.permute.xlu1 %1880 }
 0x2f5   : > { %v4933_v53 = vpop.permute.xlu0 %1895 }
 0x2f6   : > { %5473 = vst [vmem:[#allocation65_spill] sm:$0xff] %v4933_v53  ;;  %v4935_v12 = vpop.permute.xlu1 %1890 }
 0x2f9   : > { %v4937_v61 = vpop.permute.xlu0 %1905 }
 0x2fa   : > { %5474 = vst [vmem:[#allocation69_spill] sm:$0xff] %v4937_v61  ;;  %v4939_v55 = vpop.permute.xlu1 %1900 }
 0x2fb   : > { %5475 = vst [vmem:[#allocation67_spill] sm:$0xff] %v4939_v55 }
 0x2fd   : > { %v4941_v24 = vpop.permute.xlu0 %1915 }
 0x2fe   : > { %5476 = vst [vmem:[#allocation72_spill] sm:$0xff] %v4941_v24  ;;  %v4943_v44 = vpop.permute.xlu1 %1910  ;;  %v1525_v24 = vld [vmem:[#allocation3 + $0x20] sm:$0xff] }
 0x2ff   : > { %5477 = vst [vmem:[#allocation70_spill] sm:$0xff] %v4943_v44  ;;  %v1557_v50 = vmul.f32 %v4624_v25, %v1525_v24 }
 0x301   : > { %v4945_v1 = vpop.permute.xlu0 %1925 }
 0x302   : > { %5478 = vst [vmem:[#allocation10_spill] sm:$0xff] %v4945_v1  ;;  %v4947_v18 = vpop.permute.xlu1 %1920  ;;  %v1553_v1 = vmul.f32 %v4601_v58, %v1521_v41  ;;  %v1556_v58 = vmul.f32 %v4618_v32, %v1524_v31 }
 0x303   : > { %5479 = vst [vmem:[#allocation11_spill] sm:$0xff] %v4947_v18 }
 0x306   : > { %v4950_v8 = vpop.permute.xlu1 %1930 }
 0x307   : > { %5480 = vst [vmem:[#allocation73_spill] sm:$0xff] %v4950_v8  ;;  %v1527_v8 = vld [vmem:[#allocation3 + $0x30] sm:$0xff] }
 0x32b   : > { %v1590_v57 = vpop.xlane.xlu0 %1589 }
 0x32c   : > { %v1682_v43 = vadd.f32 %v1590_v57, %v1554_v37 }
 0x32e   : > { %1715 = vst.msk [vmem:[#allocation3 + $0x8] sm:$0xff] %vm335_vm0, %v1682_v43 }
 0x32f   : > { %v1593_v40 = vpop.xlane.xlu0 %1592 }
 0x330   : > { %v1683_v44 = vadd.f32 %v1593_v40, %v1555_v45 }
 0x332   : > { %1716 = vst.msk [vmem:[#allocation3 + $0x10] sm:$0xff] %vm335_vm0, %v1683_v44  ;;  %v1587_v18 = vpop.xlane.xlu1 %1586  ;;  %v1559_v44 = vmul.f32 %v4634_v23, %v1527_v8  ;;  %v1528_v8 = vld [vmem:[#allocation3 + $0x38] sm:$0xff] }
 0x333   : > { %v3258_v61 = vpop.f32.mrb[0].mxu1  ;;  %v1681_v37 = vadd.f32 %v1587_v18, %v1553_v1  ;;  %v1599_v57 = vpop.xlane.xlu0 %1598  ;;  %v1526_v1 = vld [vmem:[#allocation3 + $0x28] sm:$0xff]  ;;  %v1939_v18 = vmul.f32 0.0, %v4884_v39 }
 0x334   : > { %v3259_v55 = vpop.f32.mrb[1].mxu1  ;;  %v1685_v43 = vadd.f32 %v1599_v57, %v1557_v50  ;;  %v1529_v57 = vld [vmem:[#allocation3 + $0x40] sm:$0xff]  ;;  %v1558_v32 = vmul.f32 %v4632_v15, %v1526_v1 }
 0x335   : > { %v2391_v60 = vld [vmem:[#allocation3 + $0x8] sm:$0xff]  ;;  %1714 = vst.msk [vmem:[#allocation3] sm:$0xff] %vm335_vm0, %v1681_v37  ;;  %v3260_v45 = vadd.f32 %v3259_v55, %v3258_v61  ;;  %v3261_v40 = vpop.f32.mrb[2].mxu1  ;;  %v1561_v23 = vmul.f32 %v4645_v54, %v1529_v57 }
 0x336   : > { %3673 = vrcp.f32 %v2391_v60  ;;  %1718 = vst.msk [vmem:[#allocation3 + $0x20] sm:$0xff] %vm335_vm0, %v1685_v43  ;;  %v3262_v25 = vpop.f32.mrb[3].mxu1  ;;  %v1596_v24 = vpop.xlane.xlu1 %1595  ;;  %v1531_v60 = vld [vmem:[#allocation3 + $0x50] sm:$0xff] }
 0x337   : > { %v3263_v41 = vadd.f32 %v3262_v25, %v3261_v40  ;;  %v1684_v50 = vadd.f32 %v1596_v24, %v1556_v58  ;;  %v1605_v27 = vpop.xlane.xlu0 %1604  ;;  %v4963_v53 = vadd.f32 %v3260_v45, %v1938_v4  ;;  %v1940_v58 = vmul.f32 0.0, %v4889_v0 }
 0x338   : > { %v1687_v61 = vadd.f32 %v1605_v27, %v1559_v44  ;;  %v1560_v44 = vmul.f32 %v4640_v51, %v1528_v8 }
 0x339   : > { %1717 = vst.msk [vmem:[#allocation3 + $0x18] sm:$0xff] %vm335_vm0, %v1684_v50  ;;  %v4967_v55 = vadd.f32 %v3263_v41, %v1939_v18  ;;  %v2392_v25 = vld [vmem:[#allocation3 + $0x10] sm:$0xff]  ;;  %v1563_v18 = vmul.f32 %v4652_v36, %v1531_v60  ;;  %v1530_v41 = vld [vmem:[#allocation3 + $0x48] sm:$0xff]  ;;  %v1941_v50 = vmul.f32 0.0, %v4887_v7 }
 0x33a   : > { %1720 = vst.msk [vmem:[#allocation3 + $0x30] sm:$0xff] %vm335_vm0, %v1687_v61  ;;  %v1602_v31 = vpop.xlane.xlu1 %1601  ;;  %v1533_v61 = vld [vmem:[#allocation3 + $0x60] sm:$0xff]  ;;  %v1562_v36 = vmul.f32 %v4650_v17, %v1530_v41 }
 0x33b   : > { %v3264_v39 = vpop.f32.mrb[4].mxu1  ;;  %v1686_v37 = vadd.f32 %v1602_v31, %v1558_v32  ;;  %v1611_v43 = vpop.xlane.xlu0 %1610 }
 0x33c   : > { %v2390_v40 = vld [vmem:[#allocation3] sm:$0xff]  ;;  %v3265_v4 = vpop.f32.mrb[5].mxu1  ;;  %v1689_v45 = vadd.f32 %v1611_v43, %v1561_v23  ;;  %v1532_v43 = vld [vmem:[#allocation3 + $0x58] sm:$0xff] }
 0x33d   : > { %3675 = vrcp.f32 %v2390_v40  ;;  %1719 = vst.msk [vmem:[#allocation3 + $0x28] sm:$0xff] %vm335_vm0, %v1686_v37  ;;  %v3266_v15 = vadd.f32 %v3265_v4, %v3264_v39  ;;  %v3267_v24 = vpop.f32.mrb[6].mxu1  ;;  %v2394_v51 = vld [vmem:[#allocation3 + $0x20] sm:$0xff]  ;;  %v1565_v37 = vmul.f32 %v4663_v16, %v1533_v61 }
 0x33e   : > { %1722 = vst.msk [vmem:[#allocation3 + $0x40] sm:$0xff] %vm335_vm0, %v1689_v45  ;;  %v3268_v54 = vpop.f32.mrb[7].mxu1  ;;  %v1608_v1 = vpop.xlane.xlu1 %1607  ;;  %3677 = vrcp.f32 %v2392_v25  ;;  %v1535_v45 = vld [vmem:[#allocation3 + $0x70] sm:$0xff] }
 0x33f   : > { %v3269_v27 = vadd.f32 %v3268_v54, %v3267_v24  ;;  %v1688_v57 = vadd.f32 %v1608_v1, %v1560_v44  ;;  %v1617_v0 = vpop.xlane.xlu0 %1616  ;;  %v4977_v32 = vadd.f32 %v3266_v15, %v1940_v58  ;;  %v1942_v24 = vmul.f32 0.0, %v4893_v9 }
 0x340   : > { %v3674_v31 = vpop.eup %3673  ;;  %v2393_v23 = vld [vmem:[#allocation3 + $0x18] sm:$0xff]  ;;  %v1691_v39 = vadd.f32 %v1617_v0, %v1563_v18  ;;  %v1564_v1 = vmul.f32 %v4658_v52, %v1532_v43  ;;  %v1567_v41 = vmul.f32 %v4677_v29, %v1535_v45 }
 0x341   : > { %3679 = vrcp.f32 %v2393_v23  ;;  %1721 = vst.msk [vmem:[#allocation3 + $0x38] sm:$0xff] %vm335_vm0, %v1688_v57  ;;  %2461 = vperm.xlu0 %3431, %v3674_v31   ;;  %v4981_v8 = vadd.f32 %v3269_v27, %v1941_v50  ;;  %v2396_v44 = vld [vmem:[#allocation3 + $0x30] sm:$0xff]  ;;  %v1534_v50 = vld [vmem:[#allocation3 + $0x68] sm:$0xff]  ;;  %v1943_v57 = vmul.f32 0.0, %v4891_v20  ;;  %v1537_v31 = vld [vmem:[#allocation3 + $0x80] sm:$0xff] }
 0x342   : > { %1724 = vst.msk [vmem:[#allocation3 + $0x50] sm:$0xff] %vm335_vm0, %v1691_v39  ;;  %v1614_v7 = vpop.xlane.xlu1 %1613  ;;  %3681 = vrcp.f32 %v2394_v51  ;;  %v1566_v29 = vmul.f32 %v4668_v11, %v1534_v50  ;;  %v1536_v43 = vld [vmem:[#allocation3 + $0x78] sm:$0xff]  ;;  %v1944_v11 = vmul.f32 0.0, %v4900_v46  ;;  %v1538_v50 = vld [vmem:[#allocation3 + $0x88] sm:$0xff] }
 0x343   : > { %v3270_v60 = vpop.f32.mrb[8].mxu1  ;;  %v1690_v40 = vadd.f32 %v1614_v7, %v1562_v36  ;;  %v1623_v4 = vpop.xlane.xlu0 %1622 }
 0x344   : > { %v2395_v58 = vld [vmem:[#allocation3 + $0x28] sm:$0xff]  ;;  %v3271_v25 = vpop.f32.mrb[9].mxu1  ;;  %v1693_v15 = vadd.f32 %v1623_v4, %v1565_v37  ;;  %v1569_v37 = vmul.f32 %v4692_v35, %v1537_v31 }
 0x345   : > { %3683 = vrcp.f32 %v2395_v58  ;;  %1723 = vst.msk [vmem:[#allocation3 + $0x48] sm:$0xff] %vm335_vm0, %v1690_v40  ;;  %v3272_v17 = vadd.f32 %v3271_v25, %v3270_v60  ;;  %v3273_v54 = vpop.f32.mrb[10].mxu1  ;;  %v2398_v52 = vld [vmem:[#allocation3 + $0x40] sm:$0xff]  ;;  %v1539_v58 = vld [vmem:[#allocation3 + $0x90] sm:$0xff] }
 0x346   : > { %1726 = vst.msk [vmem:[#allocation3 + $0x60] sm:$0xff] %vm335_vm0, %v1693_v15  ;;  %v3274_v16 = vpop.f32.mrb[11].mxu1  ;;  %v1620_v18 = vpop.xlane.xlu1 %1619  ;;  %3685 = vrcp.f32 %v2396_v44 }
 0x347   : > { %v3676_v27 = vpop.eup %3675  ;;  %v3275_v0 = vadd.f32 %v3274_v16, %v3273_v54  ;;  %v1692_v9 = vadd.f32 %v1620_v18, %v1564_v1  ;;  %v1629_v61 = vpop.xlane.xlu0 %1628  ;;  %v4991_v23 = vadd.f32 %v3272_v17, %v1942_v24  ;;  %v1568_v54 = vmul.f32 %v4684_v5, %v1536_v43 }
 0x348   : > { %v2397_v39 = vld [vmem:[#allocation3 + $0x38] sm:$0xff]  ;;  %v1695_v51 = vadd.f32 %v1629_v61, %v1567_v41  ;;  %2456 = vperm.xlu1 %3432, %v3676_v27   ;;  %v3678_v7 = vpop.eup %3677  ;;  %v1571_v41 = vmul.f32 %v4709_v10, %v1539_v58  ;;  %v1541_v61 = vld [vmem:[#allocation3 + $0xa0] sm:$0xff]  ;;  %v1570_v10 = vmul.f32 %v4697_v14, %v1538_v50  ;;  %v1946_v14 = vmul.f32 0.0, %v4904_v59 }
 0x349   : > { %3687 = vrcp.f32 %v2397_v39  ;;  %1725 = vst.msk [vmem:[#allocation3 + $0x58] sm:$0xff] %vm335_vm0, %v1692_v9  ;;  %v4995_v36 = vadd.f32 %v3275_v0, %v1943_v57  ;;  %v2400_v44 = vld [vmem:[#allocation3 + $0x50] sm:$0xff]  ;;  %v1945_v57 = vmul.f32 0.0, %v4898_v22 }
 0x34a   : > { %1728 = vst.msk [vmem:[#allocation3 + $0x70] sm:$0xff] %vm335_vm0, %v1695_v51  ;;  %v1626_v20 = vpop.xlane.xlu1 %1625  ;;  %3689 = vrcp.f32 %v2398_v52 }
 0x34b   : > { %v3680_v60 = vpop.eup %3679  ;;  %v3276_v40 = vpop.f32.mrb[12].mxu1  ;;  %v1694_v4 = vadd.f32 %v1626_v20, %v1566_v29  ;;  %v1540_v20 = vld [vmem:[#allocation3 + $0x98] sm:$0xff] }
 0x34c   : > { %v1635_v45 = vpop.xlane.xlu0 %1634  ;;  %v2399_v25 = vld [vmem:[#allocation3 + $0x48] sm:$0xff]  ;;  %v3277_v15 = vpop.f32.mrb[13].mxu1  ;;  %2466 = vperm.xlu1 %3432, %v3678_v7   ;;  %2471 = vperm.xlu0 %3431, %v3680_v60   ;;  %v1573_v7 = vmul.f32 %v4721_v13, %v1541_v61 }
 0x34d   : > { %v1697_v24 = vadd.f32 %v1635_v45, %v1569_v37  ;;  %3691 = vrcp.f32 %v2399_v25  ;;  %1727 = vst.msk [vmem:[#allocation3 + $0x68] sm:$0xff] %vm335_vm0, %v1694_v4  ;;  %v3278_v17 = vadd.f32 %v3277_v15, %v3276_v40  ;;  %v3279_v35 = vpop.f32.mrb[14].mxu1  ;;  %v3682_v1 = vpop.eup %3681  ;;  %v2402_v51 = vld [vmem:[#allocation3 + $0x60] sm:$0xff]  ;;  %v1543_v4 = vld [vmem:[#allocation3 + $0xb0] sm:$0xff] }
 0x34e   : > { %v3280_v16 = vpop.f32.mrb[15].mxu1  ;;  %v1632_v18 = vpop.xlane.xlu1 %1631  ;;  %3693 = vrcp.f32 %v2400_v44 }
 0x34f   : > { %1730 = vst.msk [vmem:[#allocation3 + $0x80] sm:$0xff] %vm335_vm0, %v1697_v24  ;;  %v3684_v27 = vpop.eup %3683  ;;  %v3281_v46 = vadd.f32 %v3280_v16, %v3279_v35  ;;  %v1696_v0 = vadd.f32 %v1632_v18, %v1568_v54  ;;  %v5005_v31 = vadd.f32 %v3278_v17, %v1944_v11  ;;  %v1572_v11 = vmul.f32 %v4716_v6, %v1540_v20 }
 0x350   : > { %v1641_v9 = vpop.xlane.xlu0 %1640  ;;  %v2401_v39 = vld [vmem:[#allocation3 + $0x58] sm:$0xff]  ;;  %2476 = vperm.xlu1 %3432, %v3682_v1   ;;  %2481 = vperm.xlu0 %3431, %v3684_v27   ;;  %v3686_v22 = vpop.eup %3685  ;;  %v1575_v54 = vmul.f32 %v4738_v2, %v1543_v4  ;;  %v1542_v1 = vld [vmem:[#allocation3 + $0xa8] sm:$0xff]  ;;  %v1947_v18 = vmul.f32 0.0, %v4902_v48  ;;  %v1545_v27 = vld [vmem:[#allocation3 + $0xc0] sm:$0xff] }
 0x351   : > { %v1699_v5 = vadd.f32 %v1641_v9, %v1571_v41  ;;  %3695 = vrcp.f32 %v2401_v39  ;;  %1729 = vst.msk [vmem:[#allocation3 + $0x78] sm:$0xff] %vm335_vm0, %v1696_v0  ;;  %v5009_v52 = vadd.f32 %v3281_v46, %v1945_v57  ;;  %v2404_v15 = vld [vmem:[#allocation3 + $0x70] sm:$0xff]  ;;  %v1574_v2 = vmul.f32 %v4726_v38, %v1542_v1 }
 0x352   : > { %v1638_v29 = vpop.xlane.xlu1 %1637  ;;  %3697 = vrcp.f32 %v2402_v51  ;;  %v1577_v39 = vmul.f32 %v4750_v49, %v1545_v27  ;;  %v1948_v38 = vmul.f32 0.0, %v4911_v26  ;;  %v5481_v4 = vld [vmem:[#allocation62_spill] sm:$0xff] }
 0x353   : > { %1732 = vst.msk [vmem:[#allocation3 + $0x90] sm:$0xff] %vm335_vm0, %v1699_v5  ;;  %v3688_v37 = vpop.eup %3687  ;;  %v3282_v43 = vpop.f32.mrb[16].mxu1  ;;  %v1698_v60 = vadd.f32 %v1638_v29, %v1570_v10  ;;  %v1544_v5 = vld [vmem:[#allocation3 + $0xb8] sm:$0xff] }
 0x354   : > { %v1647_v40 = vpop.xlane.xlu0 %1646  ;;  %v2403_v45 = vld [vmem:[#allocation3 + $0x68] sm:$0xff]  ;;  %v3283_v58 = vpop.f32.mrb[17].mxu1  ;;  %2486 = vperm.xlu1 %3432, %v3686_v22   ;;  %2491 = vperm.xlu0 %3431, %v3688_v37  }
 0x355   : > { %v1701_v25 = vadd.f32 %v1647_v40, %v1573_v7  ;;  %3699 = vrcp.f32 %v2403_v45  ;;  %1731 = vst.msk [vmem:[#allocation3 + $0x88] sm:$0xff] %vm335_vm0, %v1698_v60  ;;  %v3284_v24 = vadd.f32 %v3283_v58, %v3282_v43  ;;  %v3285_v13 = vpop.f32.mrb[18].mxu1  ;;  %v3690_v44 = vpop.eup %3689  ;;  %v1547_v7 = vld [vmem:[#allocation3 + $0xd0] sm:$0xff]  ;;  %v1576_v45 = vmul.f32 %v5481_v4, %v1544_v5 }
 0x356   : > { %v3286_v17 = vpop.f32.mrb[19].mxu1  ;;  %v1644_v35 = vpop.xlane.xlu1 %1643  ;;  %3701 = vrcp.f32 %v2404_v15  ;;  %v2406_v0 = vld [vmem:[#allocation3 + $0x80] sm:$0xff] }
 0x357   : > { %1734 = vst.msk [vmem:[#allocation3 + $0xa0] sm:$0xff] %vm335_vm0, %v1701_v25  ;;  %v3692_v16 = vpop.eup %3691  ;;  %v3287_v59 = vadd.f32 %v3286_v17, %v3285_v13  ;;  %v1700_v41 = vadd.f32 %v1644_v35, %v1572_v11  ;;  %v5019_v57 = vadd.f32 %v3284_v24, %v1946_v14  ;;  %v5482_v15 = vld [vmem:[#allocation68_spill] sm:$0xff]  ;;  %v1546_v13 = vld [vmem:[#allocation3 + $0xc8] sm:$0xff] }
 0x358   : > { %v1653_v50 = vpop.xlane.xlu0 %1652  ;;  %v2405_v46 = vld [vmem:[#allocation3 + $0x78] sm:$0xff]  ;;  %2496 = vperm.xlu1 %3432, %v3690_v44   ;;  %2501 = vperm.xlu0 %3431, %v3692_v16   ;;  %v3694_v48 = vpop.eup %3693  ;;  %v1579_v24 = vmul.f32 %v5482_v15, %v1547_v7  ;;  %v1949_v44 = vmul.f32 0.0, %v4909_v21  ;;  %v1950_v7 = vmul.f32 0.0, %v4915_v62  ;;  %v1951_v15 = vmul.f32 0.0, %v4913_v28 }
 0x359   : > { %v1703_v6 = vadd.f32 %v1653_v50, %v1575_v54  ;;  %3703 = vrcp.f32 %v2405_v46  ;;  %1733 = vst.msk [vmem:[#allocation3 + $0x98] sm:$0xff] %vm335_vm0, %v1700_v41  ;;  %v5023_v9 = vadd.f32 %v3287_v59, %v1947_v18  ;;  %v1549_v54 = vld [vmem:[#allocation3 + $0xe0] sm:$0xff] }
 0x35a   : > { %v1650_v61 = vpop.xlane.xlu1 %1649  ;;  %3705 = vrcp.f32 %v2406_v0  ;;  %v2408_v60 = vld [vmem:[#allocation3 + $0x90] sm:$0xff]  ;;  %v5483_v41 = vld [vmem:[#allocation64_spill] sm:$0xff] }
 0x35b   : > { %1736 = vst.msk [vmem:[#allocation3 + $0xb0] sm:$0xff] %vm335_vm0, %v1703_v6  ;;  %v3696_v51 = vpop.eup %3695  ;;  %v3288_v10 = vpop.f32.mrb[20].mxu1  ;;  %v1702_v22 = vadd.f32 %v1650_v61, %v1574_v2  ;;  %v1578_v50 = vmul.f32 %v5483_v41, %v1546_v13  ;;  %v5484_v6 = vld [vmem:[#allocation8_spill] sm:$0xff]  ;;  %v1548_v2 = vld [vmem:[#allocation3 + $0xd8] sm:$0xff] }
 0x35c   : > { %v1659_v29 = vpop.xlane.xlu0 %1658  ;;  %v2407_v20 = vld [vmem:[#allocation3 + $0x88] sm:$0xff]  ;;  %v3289_v37 = vpop.f32.mrb[21].mxu1  ;;  %2506 = vperm.xlu1 %3432, %v3694_v48   ;;  %2511 = vperm.xlu0 %3431, %v3696_v51   ;;  %v1581_v0 = vmul.f32 %v5484_v6, %v1549_v54  ;;  %v1551_v51 = vld [vmem:[#allocation3 + $0xf0] sm:$0xff] }
 0x35d   : > { %v1705_v43 = vadd.f32 %v1659_v29, %v1577_v39  ;;  %3707 = vrcp.f32 %v2407_v20  ;;  %1735 = vst.msk [vmem:[#allocation3 + $0xa8] sm:$0xff] %vm335_vm0, %v1702_v22  ;;  %v3290_v40 = vadd.f32 %v3289_v37, %v3288_v10  ;;  %v3291_v49 = vpop.f32.mrb[22].mxu1  ;;  %v3698_v58 = vpop.eup %3697 }
 0x35e   : > { %v3292_v25 = vpop.f32.mrb[23].mxu1  ;;  %v1656_v14 = vpop.xlane.xlu1 %1655  ;;  %3709 = vrcp.f32 %v2408_v60  ;;  %v2410_v59 = vld [vmem:[#allocation3 + $0xa0] sm:$0xff] }
 0x35f   : > { %1738 = vst.msk [vmem:[#allocation3 + $0xc0] sm:$0xff] %vm335_vm0, %v1705_v43  ;;  %v3700_v11 = vpop.eup %3699  ;;  %v3293_v26 = vadd.f32 %v3292_v25, %v3291_v49  ;;  %v1704_v17 = vadd.f32 %v1656_v14, %v1576_v45  ;;  %v5033_v1 = vadd.f32 %v3290_v40, %v1948_v38  ;;  %v5485_v38 = vld [vmem:[#allocation66_spill] sm:$0xff]  ;;  %v5486_v45 = vld [vmem:[#allocation63_spill] sm:$0xff]  ;;  %v1550_v25 = vld [vmem:[#allocation3 + $0xe8] sm:$0xff] }
 0x360   : > { %v1665_v35 = vpop.xlane.xlu0 %1664  ;;  %v2409_v16 = vld [vmem:[#allocation3 + $0x98] sm:$0xff]  ;;  %2516 = vperm.xlu1 %3432, %v3698_v58   ;;  %2521 = vperm.xlu0 %3431, %v3700_v11   ;;  %v3702_v21 = vpop.eup %3701  ;;  %v1580_v60 = vmul.f32 %v5485_v38, %v1548_v2  ;;  %v1583_v58 = vmul.f32 %v5486_v45, %v1551_v51 }
 0x361   : > { %v1707_v18 = vadd.f32 %v1665_v35, %v1579_v24  ;;  %3711 = vrcp.f32 %v2409_v16  ;;  %1737 = vst.msk [vmem:[#allocation3 + $0xb8] sm:$0xff] %vm335_vm0, %v1704_v17  ;;  %v5037_v27 = vadd.f32 %v3293_v26, %v1949_v44  ;;  %v5487_v35 = vld [vmem:[#allocation9_spill] sm:$0xff] }
 0x362   : > { %v1662_v46 = vpop.xlane.xlu1 %1661  ;;  %3713 = vrcp.f32 %v2410_v59  ;;  %v2412_v20 = vld [vmem:[#allocation3 + $0xb0] sm:$0xff]  ;;  %v1582_v54 = vmul.f32 %v5487_v35, %v1550_v25  ;;  %v1552_v59 = vld [vmem:[#allocation3 + $0xf8] sm:$0xff] }
 0x363   : > { %1740 = vst.msk [vmem:[#allocation3 + $0xd0] sm:$0xff] %vm335_vm0, %v1707_v18  ;;  %v3704_v48 = vpop.eup %3703  ;;  %v3294_v61 = vpop.f32.mrb[24].mxu1  ;;  %v1706_v39 = vadd.f32 %v1662_v46, %v1578_v50 }
 0x364   : > { %v1671_v5 = vpop.xlane.xlu0 %1670  ;;  %v2411_v10 = vld [vmem:[#allocation3 + $0xa8] sm:$0xff]  ;;  %v3295_v22 = vpop.f32.mrb[25].mxu1  ;;  %2526 = vperm.xlu1 %3432, %v3702_v21   ;;  %2531 = vperm.xlu0 %3431, %v3704_v48  }
 0x365   : > { %v1709_v29 = vadd.f32 %v1671_v5, %v1581_v0  ;;  %3715 = vrcp.f32 %v2411_v10  ;;  %1739 = vst.msk [vmem:[#allocation3 + $0xc8] sm:$0xff] %vm335_vm0, %v1706_v39  ;;  %v3296_v37 = vadd.f32 %v3295_v22, %v3294_v61  ;;  %v3297_v43 = vpop.f32.mrb[26].mxu1  ;;  %v3706_v40 = vpop.eup %3705  ;;  %v1952_v0 = vmul.f32 0.0, %v4919_v47 }
 0x366   : > { %v3298_v49 = vpop.f32.mrb[27].mxu1  ;;  %v1668_v4 = vpop.xlane.xlu1 %1667  ;;  %3717 = vrcp.f32 %v2412_v20  ;;  %v2414_v17 = vld [vmem:[#allocation3 + $0xc0] sm:$0xff]  ;;  %v1584_v39 = vmul.f32 %v4906_v30, %v1552_v59 }
 0x367   : > { %1742 = vst.msk [vmem:[#allocation3 + $0xe0] sm:$0xff] %vm335_vm0, %v1709_v29  ;;  %v3708_v14 = vpop.eup %3707  ;;  %v3299_v62 = vadd.f32 %v3298_v49, %v3297_v43  ;;  %v1708_v24 = vadd.f32 %v1668_v4, %v1580_v60  ;;  %v5047_v11 = vadd.f32 %v3296_v37, %v1950_v7  ;;  %v1953_v29 = vmul.f32 0.0, %v4917_v56 }
 0x368   : > { %v1677_v13 = vpop.xlane.xlu0 %1676  ;;  %v2413_v44 = vld [vmem:[#allocation3 + $0xb8] sm:$0xff]  ;;  %2536 = vperm.xlu1 %3432, %v3706_v40   ;;  %2541 = vperm.xlu0 %3431, %v3708_v14   ;;  %v3710_v18 = vpop.eup %3709  ;;  %v1954_v4 = vmul.f32 0.0, %v4923_v63 }
 0x369   : > { %v1711_v26 = vadd.f32 %v1677_v13, %v1583_v58  ;;  %3719 = vrcp.f32 %v2413_v44  ;;  %1741 = vst.msk [vmem:[#allocation3 + $0xd8] sm:$0xff] %vm335_vm0, %v1708_v24  ;;  %v5051_v16 = vadd.f32 %v3299_v62, %v1951_v15  ;;  %v1955_v24 = vmul.f32 0.0, %v4921_v19 }
 0x36a   : > { %v1674_v28 = vpop.xlane.xlu1 %1673  ;;  %3721 = vrcp.f32 %v2414_v17  ;;  %v2416_v2 = vld [vmem:[#allocation3 + $0xd0] sm:$0xff] }
 0x36b   : > { %1744 = vst.msk [vmem:[#allocation3 + $0xf0] sm:$0xff] %vm335_vm0, %v1711_v26  ;;  %v3712_v41 = vpop.eup %3711  ;;  %v3300_v50 = vpop.f32.mrb[28].mxu1  ;;  %v1710_v21 = vadd.f32 %v1674_v28, %v1582_v54  ;;  %v1956_v28 = vmul.f32 0.0, %v4927_v33  ;;  %v1958_v33 = vmul.f32 0.0, %v4931_v42 }
 0x36c   : > { %v2415_v46 = vld [vmem:[#allocation3 + $0xc8] sm:$0xff]  ;;  %v3301_v6 = vpop.f32.mrb[29].mxu1  ;;  %2546 = vperm.xlu1 %3432, %v3710_v18   ;;  %2551 = vperm.xlu0 %3431, %v3712_v41   ;;  %v3714_v5 = vpop.eup %3713 }
 0x36d   : > { %3723 = vrcp.f32 %v2415_v46  ;;  %1743 = vst.msk [vmem:[#allocation3 + $0xe8] sm:$0xff] %vm335_vm0, %v1710_v21  ;;  %v3302_v48 = vadd.f32 %v3301_v6, %v3300_v50  ;;  %v3303_v61 = vpop.f32.mrb[30].mxu1  ;;  %v1957_v46 = vmul.f32 0.0, %v4925_v34  ;;  %v1959_v34 = vmul.f32 0.0, %v4929_v3 }
 0x36e   : > { %v3304_v51 = vpop.f32.mrb[31].mxu1  ;;  %v1680_v10 = vpop.xlane.xlu1 %1679  ;;  %3725 = vrcp.f32 %v2416_v2  ;;  %v2418_v43 = vld [vmem:[#allocation3 + $0xe0] sm:$0xff] }
 0x36f   : > { %v3716_v22 = vpop.eup %3715  ;;  %v3305_v7 = vadd.f32 %v3304_v51, %v3303_v61  ;;  %v1712_v20 = vadd.f32 %v1680_v10, %v1584_v39  ;;  %v5058_v37 = vadd.f32 %v3302_v48, %v1952_v0 }
 0x370   : > { %v2417_v47 = vld [vmem:[#allocation3 + $0xd8] sm:$0xff]  ;;  %2556 = vperm.xlu1 %3432, %v3714_v5   ;;  %2561 = vperm.xlu0 %3431, %v3716_v22   ;;  %v3718_v30 = vpop.eup %3717 }
 0x371   : > { %3727 = vrcp.f32 %v2417_v47  ;;  %1745 = vst.msk [vmem:[#allocation3 + $0xf8] sm:$0xff] %vm335_vm0, %v1712_v20  ;;  %v5061_v38 = vadd.f32 %v3305_v7, %v1953_v29 }
 0x372   : > { %3729 = vrcp.f32 %v2418_v43  ;;  %v2420_v45 = vld [vmem:[#allocation3 + $0xf0] sm:$0xff] }
 0x373   : > { %v3720_v60 = vpop.eup %3719  ;;  %v3306_v40 = vpop.f32.mrb[32].mxu1 }
 0x374   : > { %v2419_v49 = vld [vmem:[#allocation3 + $0xe8] sm:$0xff]  ;;  %v3307_v56 = vpop.f32.mrb[33].mxu1  ;;  %2566 = vperm.xlu1 %3432, %v3718_v30   ;;  %2571 = vperm.xlu0 %3431, %v3720_v60   ;;  %v3722_v14 = vpop.eup %3721  ;;  %v1960_v30 = vmul.f32 0.0, %v4935_v12 }
 0x375   : > { %3731 = vrcp.f32 %v2419_v49  ;;  %v3308_v58 = vadd.f32 %v3307_v56, %v3306_v40  ;;  %v3309_v25 = vpop.f32.mrb[34].mxu1  ;;  %v5488_v56 = vld [vmem:[#allocation65_spill] sm:$0xff] }
 0x376   : > { %v3310_v15 = vpop.f32.mrb[35].mxu1  ;;  %3733 = vrcp.f32 %v2420_v45 }
 0x377   : > { %v3724_v62 = vpop.eup %3723  ;;  %v3311_v13 = vadd.f32 %v3310_v15, %v3309_v25  ;;  %v5065_v44 = vadd.f32 %v3308_v58, %v1954_v4  ;;  %v1961_v4 = vmul.f32 0.0, %v5488_v56 }
 0x378   : > { %v2421_v26 = vld [vmem:[#allocation3 + $0xf8] sm:$0xff]  ;;  %2576 = vperm.xlu1 %3432, %v3722_v14   ;;  %2581 = vperm.xlu0 %3431, %v3724_v62   ;;  %v3726_v63 = vpop.eup %3725 }
 0x379   : > { %3735 = vrcp.f32 %v2421_v26  ;;  %v5067_v17 = vadd.f32 %v3311_v13, %v1955_v24  ;;  %v5489_v14 = vld [vmem:[#allocation67_spill] sm:$0xff]  ;;  %v5490_v26 = vld [vmem:[#allocation69_spill] sm:$0xff] }
 0x37a   : > { %v1962_v15 = vmul.f32 0.0, %v5489_v14 }
 0x37b   : > { %v3728_v35 = vpop.eup %3727  ;;  %v3312_v54 = vpop.f32.mrb[36].mxu1 }
 0x37c   : > { %v3313_v18 = vpop.f32.mrb[37].mxu1  ;;  %2586 = vperm.xlu1 %3432, %v3726_v63   ;;  %2591 = vperm.xlu0 %3431, %v3728_v35   ;;  %v3730_v41 = vpop.eup %3729  ;;  %v1963_v63 = vmul.f32 0.0, %v5490_v26 }
 0x37d   : > { %v3314_v59 = vadd.f32 %v3313_v18, %v3312_v54  ;;  %v3315_v19 = vpop.f32.mrb[38].mxu1 }
 0x37e   : > { %v3316_v50 = vpop.f32.mrb[39].mxu1 }
 0x37f   : > { %v3732_v21 = vpop.eup %3731  ;;  %v3317_v6 = vadd.f32 %v3316_v50, %v3315_v19  ;;  %v5071_v0 = vadd.f32 %v3314_v59, %v1956_v28  ;;  %v5491_v59 = vld [vmem:[#allocation70_spill] sm:$0xff] }
 0x380   : > { %2596 = vperm.xlu1 %3432, %v3730_v41   ;;  %2601 = vperm.xlu0 %3431, %v3732_v21   ;;  %v3734_v48 = vpop.eup %3733  ;;  %v1964_v19 = vmul.f32 0.0, %v5491_v59 }
 0x381   : > { %v5073_v2 = vadd.f32 %v3317_v6, %v1957_v46  ;;  %v5492_v46 = vld [vmem:[#allocation72_spill] sm:$0xff] }
 0x382   : > { %v1965_v6 = vmul.f32 0.0, %v5492_v46 }
 0x383   : > { %v3736_v61 = vpop.eup %3735  ;;  %v3318_v39 = vpop.f32.mrb[40].mxu1 }
 0x384   : > { %v3319_v5 = vpop.f32.mrb[41].mxu1  ;;  %2606 = vperm.xlu1 %3432, %v3734_v48   ;;  %2611 = vperm.xlu0 %3431, %v3736_v61  }
 0x385   : > { %v3320_v51 = vadd.f32 %v3319_v5, %v3318_v39  ;;  %v3321_v10 = vpop.f32.mrb[42].mxu1 }
 0x386   : > { %v3322_v22 = vpop.f32.mrb[43].mxu1 }
 0x387   : > { %v3323_v29 = vadd.f32 %v3322_v22, %v3321_v10  ;;  %v5077_v7 = vadd.f32 %v3320_v51, %v1958_v33  ;;  %v5493_v51 = vld [vmem:[#allocation11_spill] sm:$0xff] }
 0x388   : > { %v1966_v10 = vmul.f32 0.0, %v5493_v51 }
 0x389   : > { %v5079_v20 = vadd.f32 %v3323_v29, %v1959_v34 }
 0x38b   : > { %v3324_v47 = vpop.f32.mrb[44].mxu1 }
 0x38c   : > { %v3325_v43 = vpop.f32.mrb[45].mxu1 }
 0x38d   : > { %v3326_v60 = vadd.f32 %v3325_v43, %v3324_v47  ;;  %v3327_v40 = vpop.f32.mrb[46].mxu1  ;;  %v5494_v47 = vld [vmem:[#allocation10_spill] sm:$0xff] }
 0x38e   : > { %v3328_v49 = vpop.f32.mrb[47].mxu1  ;;  %v1967_v43 = vmul.f32 0.0, %v5494_v47 }
 0x38f   : > { %v3329_v42 = vadd.f32 %v3328_v49, %v3327_v40  ;;  %v5083_v45 = vadd.f32 %v3326_v60, %v1960_v30 }
 0x391   : > { %v5085_v58 = vadd.f32 %v3329_v42, %v1961_v4  ;;  %v5495_v4 = vld [vmem:[#allocation73_spill] sm:$0xff] }
 0x392   : > { %v1968_v42 = vmul.f32 0.0, %v5495_v4 }
 0x393   : > { %v3330_v3 = vpop.f32.mrb[48].mxu1 }
 0x394   : > { %v3331_v25 = vpop.f32.mrb[49].mxu1 }
 0x395   : > { %v3332_v62 = vadd.f32 %v3331_v25, %v3330_v3  ;;  %v3333_v24 = vpop.f32.mrb[50].mxu1 }
 0x396   : > { %v3334_v13 = vpop.f32.mrb[51].mxu1 }
 0x397   : > { %v3335_v12 = vadd.f32 %v3334_v13, %v3333_v24  ;;  %v5089_v35 = vadd.f32 %v3332_v62, %v1962_v15  ;;  %v5110_v24 = vpop.permute.xlu0 %1935 }
 0x399   : > { %v5091_v54 = vadd.f32 %v3335_v12, %v1963_v63 }
 0x39b   : > { %v3336_v18 = vpop.f32.mrb[52].mxu1 }
 0x39c   : > { %v3337_v28 = vpop.f32.mrb[53].mxu1 }
 0x39d   : > { %v3338_v41 = vadd.f32 %v3337_v28, %v3336_v18  ;;  %v3339_v50 = vpop.f32.mrb[54].mxu1 }
 0x39e   : > { %v3340_v21 = vpop.f32.mrb[55].mxu1 }
 0x39f   : > { %v3341_v48 = vadd.f32 %v3340_v21, %v3339_v50  ;;  %v5095_v61 = vadd.f32 %v3338_v41, %v1964_v19 }
 0x3a1   : > { %v5097_v39 = vadd.f32 %v3341_v48, %v1965_v6 }
 0x3a3   : > { %v3342_v5 = vpop.f32.mrb[56].mxu1 }
 0x3a4   : > { %v3343_v33 = vpop.f32.mrb[57].mxu1 }
 0x3a5   : > { %v3344_v22 = vadd.f32 %v3343_v33, %v3342_v5  ;;  %v3345_v34 = vpop.f32.mrb[58].mxu1 }
 0x3a6   : > { %v3346_v29 = vpop.f32.mrb[59].mxu1 }
 0x3a7   : > { %v3347_v30 = vadd.f32 %v3346_v29, %v3345_v34  ;;  %v5101_v60 = vadd.f32 %v3344_v22, %v1966_v10 }
 0x3a9   : > { %v5103_v40 = vadd.f32 %v3347_v30, %v1967_v43 }
 0x3ab   : > { %v3348_v49 = vpop.f32.mrb[60].mxu1 }
 0x3ac   : > { %v3349_v56 = vpop.f32.mrb[61].mxu1 }
 0x3ad   : > { %v3350_v3 = vadd.f32 %v3349_v56, %v3348_v49  ;;  %v3351_v25 = vpop.f32.mrb[62].mxu1 }
 0x3ae   : > { %v3352_v14 = vpop.f32.mrb[63].mxu1 }
 0x3af   : > { %v5106_v15 = vadd.f32 %v3352_v14, %v3351_v25  ;;  %v5108_v62 = vadd.f32 %v3350_v3, %v1968_v42 }
 0x3c0   : > { %v2462_v13 = vpop.permute.xlu0 %2461 }
 0x3c1   : > { %v2615_v63 = vmul.f32 %v2462_v13, %v4967_v55 }
 0x3c7   : > { %v2457_v26 = vpop.permute.xlu1 %2456 }
 0x3c8   : > { %v2614_v12 = vmul.f32 %v2457_v26, %v4963_v53 }
 0x3ca   : > { %v3102_v18 = vpack.c.bf16 %v2615_v63, %v2614_v12 }
 0x3cb   : > { %v2472_v28 = vpop.permute.xlu0 %2471  ;;  %v2467_v59 = vpop.permute.xlu1 %2466 }
 0x3cc   : > { %3103 = vst [vmem:[%s5117_s7] sm:$0xff] %v3102_v18   ;;  %v2617_v19 = vmul.f32 %v2472_v28, %v4981_v8  ;;  %v2616_v41 = vmul.f32 %v2467_v59, %v4977_v32 }
 0x3ce   : > { %v3107_v50 = vpack.c.bf16 %v2617_v19, %v2616_v41 }
 0x3cf   : > { %v2482_v21 = vpop.permute.xlu0 %2481  ;;  %v2477_v46 = vpop.permute.xlu1 %2476 }
 0x3d0   : > { %3179 = vst [vmem:[%s5117_s7 + $0x8] sm:$0xff] %v3107_v50   ;;  %v2619_v53 = vmul.f32 %v2482_v21, %v4995_v36  ;;  %v2618_v55 = vmul.f32 %v2477_v46, %v4991_v23 }
 0x3d2   : > { %v3112_v6 = vpack.c.bf16 %v2619_v53, %v2618_v55 }
 0x3d3   : > { %v2492_v48 = vpop.permute.xlu0 %2491  ;;  %v2487_v5 = vpop.permute.xlu1 %2486 }
 0x3d4   : > { %3180 = vst [vmem:[%s5117_s7 + $0x10] sm:$0xff] %v3112_v6   ;;  %v2621_v33 = vmul.f32 %v2492_v48, %v5009_v52  ;;  %v2620_v8 = vmul.f32 %v2487_v5, %v5005_v31 }
 0x3d6   : > { %v3117_v32 = vpack.c.bf16 %v2621_v33, %v2620_v8  ;;  %v1969_v33 = vmul.f32 0.0, %v5110_v24 }
 0x3d7   : > { %v2502_v51 = vpop.permute.xlu0 %2501  ;;  %v2497_v10 = vpop.permute.xlu1 %2496 }
 0x3d8   : > { %3181 = vst [vmem:[%s5117_s7 + $0x18] sm:$0xff] %v3117_v32   ;;  %v2623_v22 = vmul.f32 %v2502_v51, %v5023_v9  ;;  %v2622_v36 = vmul.f32 %v2497_v10, %v5019_v57 }
 0x3da   : > { %v3122_v23 = vpack.c.bf16 %v2623_v22, %v2622_v36 }
 0x3db   : > { %v2512_v34 = vpop.permute.xlu0 %2511  ;;  %v2507_v29 = vpop.permute.xlu1 %2506 }
 0x3dc   : > { %3182 = vst [vmem:[%s5117_s7 + $0x20] sm:$0xff] %v3122_v23   ;;  %v2625_v47 = vmul.f32 %v2512_v34, %v5037_v27  ;;  %v2624_v52 = vmul.f32 %v2507_v29, %v5033_v1 }
 0x3de   : > { %v3127_v31 = vpack.c.bf16 %v2625_v47, %v2624_v52 }
 0x3df   : > { %v2522_v43 = vpop.permute.xlu0 %2521  ;;  %v2517_v30 = vpop.permute.xlu1 %2516 }
 0x3e0   : > { %3183 = vst [vmem:[%s5117_s7 + $0x28] sm:$0xff] %v3127_v31   ;;  %v2627_v49 = vmul.f32 %v2522_v43, %v5051_v16  ;;  %v2626_v9 = vmul.f32 %v2517_v30, %v5047_v11 }
 0x3e2   : > { %v3132_v57 = vpack.c.bf16 %v2627_v49, %v2626_v9 }
 0x3e3   : > { %v2532_v56 = vpop.permute.xlu0 %2531  ;;  %v2527_v4 = vpop.permute.xlu1 %2526 }
 0x3e4   : > { %3184 = vst [vmem:[%s5117_s7 + $0x30] sm:$0xff] %v3132_v57   ;;  %v2629_v42 = vmul.f32 %v2532_v56, %v5061_v38  ;;  %v2628_v27 = vmul.f32 %v2527_v4, %v5058_v37 }
 0x3e6   : > { %v3137_v1 = vpack.c.bf16 %v2629_v42, %v2628_v27 }
 0x3e7   : > { %v2542_v3 = vpop.permute.xlu0 %2541  ;;  %v2537_v25 = vpop.permute.xlu1 %2536 }
 0x3e8   : > { %3185 = vst [vmem:[%s5117_s7 + $0x38] sm:$0xff] %v3137_v1   ;;  %v2631_v14 = vmul.f32 %v2542_v3, %v5067_v17  ;;  %v2630_v16 = vmul.f32 %v2537_v25, %v5065_v44 }
 0x3ea   : > { %v3142_v11 = vpack.c.bf16 %v2631_v14, %v2630_v16 }
 0x3eb   : > { %v2552_v13 = vpop.permute.xlu0 %2551  ;;  %v2547_v26 = vpop.permute.xlu1 %2546 }
 0x3ec   : > { %3186 = vst [vmem:[%s5117_s7 + $0x40] sm:$0xff] %v3142_v11   ;;  %v2633_v63 = vmul.f32 %v2552_v13, %v5073_v2  ;;  %v2632_v38 = vmul.f32 %v2547_v26, %v5071_v0 }
 0x3ee   : > { %v3147_v37 = vpack.c.bf16 %v2633_v63, %v2632_v38 }
 0x3ef   : > { %v2562_v12 = vpop.permute.xlu0 %2561  ;;  %v2557_v18 = vpop.permute.xlu1 %2556 }
 0x3f0   : > { %3187 = vst [vmem:[%s5117_s7 + $0x48] sm:$0xff] %v3147_v37   ;;  %v2635_v28 = vmul.f32 %v2562_v12, %v5079_v20  ;;  %v2634_v17 = vmul.f32 %v2557_v18, %v5077_v7 }
 0x3f2   : > { %v3152_v44 = vpack.c.bf16 %v2635_v28, %v2634_v17 }
 0x3f3   : > { %v2572_v59 = vpop.permute.xlu0 %2571  ;;  %v2567_v19 = vpop.permute.xlu1 %2566 }
 0x3f4   : > { %3188 = vst [vmem:[%s5117_s7 + $0x50] sm:$0xff] %v3152_v44   ;;  %v2637_v41 = vmul.f32 %v2572_v59, %v5085_v58  ;;  %v2636_v2 = vmul.f32 %v2567_v19, %v5083_v45 }
 0x3f6   : > { %v3157_v0 = vpack.c.bf16 %v2637_v41, %v2636_v2 }
 0x3f7   : > { %v2582_v50 = vpop.permute.xlu0 %2581  ;;  %v2577_v21 = vpop.permute.xlu1 %2576 }
 0x3f8   : > { %3189 = vst [vmem:[%s5117_s7 + $0x58] sm:$0xff] %v3157_v0   ;;  %v2639_v20 = vmul.f32 %v2582_v50, %v5091_v54  ;;  %v2638_v7 = vmul.f32 %v2577_v21, %v5089_v35 }
 0x3fa   : > { %v3162_v46 = vpack.c.bf16 %v2639_v20, %v2638_v7 }
 0x3fb   : > { %v2592_v53 = vpop.permute.xlu0 %2591  ;;  %v2587_v55 = vpop.permute.xlu1 %2586 }
 0x3fc   : > { %3190 = vst [vmem:[%s5117_s7 + $0x60] sm:$0xff] %v3162_v46   ;;  %v2641_v6 = vmul.f32 %v2592_v53, %v5097_v39  ;;  %v2640_v58 = vmul.f32 %v2587_v55, %v5095_v61  ;;  %v2290_v61 = vadd.f32 %v5106_v15, %v1969_v33 }
 0x3fe   : > { %v3167_v45 = vpack.c.bf16 %v2641_v6, %v2640_v58 }
 0x3ff   : > { %v2602_v48 = vpop.permute.xlu0 %2601  ;;  %v2597_v5 = vpop.permute.xlu1 %2596 }
 0x400   : > { %3191 = vst [vmem:[%s5117_s7 + $0x68] sm:$0xff] %v3167_v45   ;;  %v2643_v35 = vmul.f32 %v2602_v48, %v5103_v40  ;;  %v2642_v54 = vmul.f32 %v2597_v5, %v5101_v60 }
 0x402   : > { %v3172_v39 = vpack.c.bf16 %v2643_v35, %v2642_v54 }
 0x403   : > { %v2612_v8 = vpop.permute.xlu0 %2611  ;;  %v2607_v32 = vpop.permute.xlu1 %2606 }
 0x404   : > { %3192 = vst [vmem:[%s5117_s7 + $0x70] sm:$0xff] %v3172_v39   ;;  %v2645_v51 = vmul.f32 %v2612_v8, %v2290_v61  ;;  %v2644_v10 = vmul.f32 %v2607_v32, %v5108_v62 }
 0x406   : > { %v3177_v60 = vpack.c.bf16 %v2645_v51, %v2644_v10 }
 0x408   : > { %3193 = vst [vmem:[%s5117_s7 + $0x78] sm:$0xff] %v3177_v60  }
 0x409   : > { %3750 = shalt.err (!%p3747_p7)
}
 0x40a   : > { %s3751_s4 = scalar_lea.hbm %s5173_s20, 2048  ;;  %s3755_s7 = scalar_lea.hbm %s5233_s3, 16384 }
 0x40b   : > { %p3752_p9 = scmp.ne.s32.totalorder %s5173_s20, %s3751_s4  ;;  %p3756_p12 = scmp.lt.u32.totalorder %s5173_s20, %s5233_s3 }
 0x40c   : > { %p3757_p13 = scmp.lt.u32.totalorder %s3755_s7, %s3751_s4  ;;  %p3759_p1 = scmp.lt.u32.totalorder %s3751_s4, %s5173_s20 }
 0x40d   : > { %p3753_p10 = pnand %p3752_p9, %p3911_p3 }
 0x40e   : > { %p3758_p0 = por %p3757_p13, %p3756_p12 }
 0x40f   : > { %p3754_p11 = pneg %p3753_p10 }
 0x410   : > { %p3760_p2 = por %p3759_p1, %p3758_p0 }
 0x412   : > { %p3761_p4 = pnand %p3760_p2, %p3754_p11 }
 0x414   : > { %3764 = shalt.err (!%p3761_p4)
}
 0x415   : > { %s3837_s11 = smov 64   ;;  %s3838_s15 = smov 256  }
 0x416   : > { %s3839_s16 = smov 4  }
 0x417   : > { %3354 = dma.vmem_to_hbm [thread:$0]  (%p3911_p3), %s5168_s10, 2048, %s5173_s20, %s5178_s21, %s3837_s11, %s3838_s15, %s3839_s16  }
 0x418 PF: > { %p3360_p5 = scmp.ge.s32.totalorder %s3831_s19, 2  ;;  %s2839_s24 = sand.u32 1, %s3803_s12  }
 0x419   : > { %s2840_s27 = scalar_lea.sflag [#allocation6], %s2839_s24 }
 0x41a   : > { %p3357_p6 = pnand %p3360_p5, %p3920_p8 }
 0x41c   : > { %3798 = dma.done.wait (!%p3357_p6), %s2840_s27, 2048  }
 0x41d   : > { %3800 = vsyncadd (!%p3357_p6), %s2840_s27, 4294965248  ;;  %s16_s19 = sadd.s32 1, %s3831_s19   ;;  %s5496_s12 = smov %s3807_s13 }
 0x41e   : > { %p13_p7 = scmp.ge.s32.totalorder %s16_s19, 10   ;;  %s5497_s13 = smov %s3811_s14 }
 0x41f   : > { %s5498_s14 = smov %s3929_s30  ;;  %s5499_s15 = smov %s3823_s17 }
 0x420   : > { %s5500_s16 = smov %s3827_s18  ;;  %s5501_s17 = smov %s5504_s22 }
 0x421   : > { %s5502_s18 = smov %s5508_s23  ;;  %15 = sbr.rel (!%p13_p7) target bundleno = 5 (0x5), region = 81 }
 0x428   :  { %2845 = vsyncpa [#allocation6], 1 }
 0x429   :  { %2847 = vsyncpa [#allocation6 + $0x1], 1 }

</bundles_post_ra>
